<compile_context>
chip_gen: v7x
topology: tpu7x:2x2x1
jax: 0.10.0
libtpu: 0.0.40
codegen_flags: <defaults>
</compile_context>

<pallas_src>
import functools

import jax
import jax.numpy as jnp
from jax import lax
from jax.experimental import pallas as pl
from jax.experimental.pallas import tpu as pltpu

LEAKY_SLOPE = 0.1
BN_EPS = 1e-5
K_DW = 5  # depthwise filter size


def _leaky(x):
    return jnp.maximum(x, LEAKY_SLOPE * x)


def _pointwise(x, w, b):
    """1x1 conv + bias + leaky as unrolled VPU FMAs.

    x: (Cin, P) activations, P = H*W in lanes.
    w: (Cout, Cin) BN-folded weight.   b: (Cout, 1) bias.
    """
    cout, cin = w.shape
    p = x.shape[-1]
    acc = jnp.broadcast_to(b, (cout, p))
    for ci in range(cin):                                  # unrolled: cin <= 8
        acc = acc + w[:, ci:ci + 1] * x[ci:ci + 1, :]
    return _leaky(acc)


def _depthwise(x, w, b, masks, *, W, K):
    """KxK depthwise conv ('same' zero padding) + bias + leaky.

    x: (C, P) with P = H*W flattened (W fastest / lanes).
    w: (C, K*K) BN-folded weight.  b: (C, 1).
    masks: (K*K, P) 0/1 border masks (0 where a tap would read out of bounds).
    Each tap is a static lane rotation of the flattened image.
    """
    c, p = x.shape
    pad = K // 2
    acc = jnp.broadcast_to(b, (c, p))
    for dh in range(K):                                    # unrolled 25 taps
        for dw in range(K):
            s = (dh - pad) * W + (dw - pad)                # flat source offset
            src = x if s == 0 else pltpu.roll(x, shift=(-s) % p, axis=1)
            t = dh * K + dw
            term = src * w[:, t:t + 1]
            if dh != pad or dw != pad:                     # center tap mask==1
                term = term * masks[t:t + 1, :]
            acc = acc + term
    return _leaky(acc)


def _fused_kernel(x_ref, mask_ref,
                  w0_ref, b0_ref,      # conv_0      1x1   (ch_in -> ch_out)
                  w1_ref, b1_ref,      # conv_1      5x5 depthwise
                  w2_ref, b2_ref,      # conv_2      1x1
                  w3_ref, b3_ref,      # conv_route  5x5 depthwise
                  w4_ref, b4_ref,      # tip         1x1
                  route_ref, tip_ref, *, W, K):
    x = x_ref[0].astype(jnp.float32)                       # (Cin, P)
    masks = mask_ref[...]                                  # (K*K, P)

    h = _pointwise(x, w0_ref[...], b0_ref[...])
    h = _depthwise(h, w1_ref[...], b1_ref[...], masks, W=W, K=K)
    h = _pointwise(h, w2_ref[...], b2_ref[...])
    route = _depthwise(h, w3_ref[...], b3_ref[...], masks, W=W, K=K)
    tip = _pointwise(route, w4_ref[...], b4_ref[...])

    route_ref[0] = route.astype(route_ref.dtype)           # lane-dense stores
    tip_ref[0] = tip.astype(tip_ref.dtype)


def _make_dw_masks(H, W, K):
    """(K*K, H*W) float 0/1 masks: 0 where tap (dh,dw) reads outside the image."""
    pad = K // 2
    hh = jnp.arange(H, dtype=jnp.int32).reshape(H, 1)
    ww = jnp.arange(W, dtype=jnp.int32).reshape(1, W)
    rows = []
    for dh in range(K):
        for dw in range(K):
            hs = hh + (dh - pad)
            ws = ww + (dw - pad)
            ok = (hs >= 0) & (hs < H) & (ws >= 0) & (ws < W)
            rows.append(ok.astype(jnp.float32).reshape(1, H * W))
    return jnp.concatenate(rows, axis=0)


def ppyolo_tiny_det_block(x_nchw, params):
    """Fused forward of PPYOLOTinyDetBlock. Returns (route, tip), both NCHW."""
    N, Cin, H, W = x_nchw.shape
    Cout = params["conv_0"][0].shape[0]
    P = H * W
    K = K_DW

    x_flat = x_nchw.reshape(N, Cin, P)          # NCHW -> (N, C, H*W): free reshape
    masks = _make_dw_masks(H, W, K)

    order = ("conv_0", "conv_1", "conv_2", "conv_route", "tip")
    weight_args, weight_specs = [], []
    for name in order:
        w, b = params[name]
        weight_args += [w, b]
        weight_specs += [pl.BlockSpec(w.shape, lambda n: (0, 0)),
                         pl.BlockSpec(b.shape, lambda n: (0, 0))]

    out_sds = jax.ShapeDtypeStruct((N, Cout, P), x_nchw.dtype)
    out_spec = pl.BlockSpec((1, Cout, P), lambda n: (n, 0, 0))

    route_flat, tip_flat = pl.pallas_call(
        functools.partial(_fused_kernel, W=W, K=K),
        out_shape=(out_sds, out_sds),
        grid=(N,),
        in_specs=[pl.BlockSpec((1, Cin, P), lambda n: (n, 0, 0)),
                  pl.BlockSpec((K * K, P), lambda n: (0, 0))] + weight_specs,
        out_specs=(out_spec, out_spec),
        compiler_params=pltpu.CompilerParams(
            dimension_semantics=("parallel",)),
    )(x_flat, masks, *weight_args)

    return (route_flat.reshape(N, Cout, H, W),
            tip_flat.reshape(N, Cout, H, W))


# ---------------------------------------------------------------------------
# Parameters (deterministic synthetic init, BN folded into weight & bias)
# ---------------------------------------------------------------------------
def make_params(key, ch_in, ch_out, k=K_DW):
    cfgs = [
        ("conv_0", ch_in, ch_out, 1),
        ("conv_1", ch_out, ch_out, k),        # depthwise
        ("conv_2", ch_out, ch_out, 1),
        ("conv_route", ch_out, ch_out, k),    # depthwise
        ("tip", ch_out, ch_out, 1),
    ]
    params = {}
    for name, cin, cout, ks in cfgs:
        key, wk, gk, bk, mk, vk = jax.random.split(key, 6)
        if ks == 1:
            w = 0.1 * jax.random.normal(wk, (cout, cin), jnp.float32)
        else:
            w = 0.1 * jax.random.normal(wk, (cout, ks, ks), jnp.float32)
        gamma = 1.0 + 0.1 * jax.random.normal(gk, (cout,), jnp.float32)
        beta = 0.1 * jax.random.normal(bk, (cout,), jnp.float32)
        mean = 0.1 * jax.random.normal(mk, (cout,), jnp.float32)
        var = jnp.abs(jax.random.normal(vk, (cout,), jnp.float32)) + 0.5
        scale = gamma * jax.lax.rsqrt(var + BN_EPS)
        bias = beta - mean * scale
        # Fold BN scale into the conv weight (per output channel).
        if ks == 1:
            wf = w * scale[:, None]                              # (cout, cin)
        else:
            wf = (w * scale[:, None, None]).reshape(cout, ks * ks)  # (cout, K*K)
        params[name] = (wf, bias.reshape(cout, 1))
    return params


# ---------------------------------------------------------------------------
# Pure-JAX reference (on the folded params) for validation
# ---------------------------------------------------------------------------
def _ref_forward(x_nchw, params, K=K_DW):
    def pw(x, w, b):
        y = jnp.einsum("nchw,oc->nohw", x, w, precision=lax.Precision.HIGHEST)
        y = y + b.reshape(1, -1, 1, 1)
        return jnp.maximum(y, LEAKY_SLOPE * y)

    def dw(x, w, b):
        cout = w.shape[0]
        wk = w.reshape(cout, 1, K, K)
        y = lax.conv_general_dilated(
            x, wk, window_strides=(1, 1),
            padding=((K // 2, K // 2), (K // 2, K // 2)),
            dimension_numbers=("NCHW", "OIHW", "NCHW"),
            feature_group_count=cout,
            precision=lax.Precision.HIGHEST)
        y = y + b.reshape(1, -1, 1, 1)
        return jnp.maximum(y, LEAKY_SLOPE * y)

    h = pw(x_nchw, *params["conv_0"])
    h = dw(h, *params["conv_1"])
    h = pw(h, *params["conv_2"])
    route = dw(h, *params["conv_route"])
    tip = pw(route, *params["tip"])
    return route, tip


if __name__ == "__main__":
    N, ch_in, ch_out, H, W = 2, 4, 8, 16, 16
    key = jax.random.PRNGKey(0)
    kx, kp = jax.random.split(key)
    x = jax.random.normal(kx, (N, ch_in, H, W), jnp.float32)
    params = make_params(kp, ch_in, ch_out)

    route, tip = jax.jit(ppyolo_tiny_det_block)(x, params)
    jax.block_until_ready((route, tip))

    assert route.shape == (N, ch_out, H, W), route.shape
    assert tip.shape == (N, ch_out, H, W), tip.shape
    assert route.dtype == jnp.float32 and tip.dtype == jnp.float32

    route_ref, tip_ref = _ref_forward(x, params)
    assert jnp.allclose(route, route_ref, rtol=1e-3, atol=1e-3), \
        float(jnp.max(jnp.abs(route - route_ref)))
    assert jnp.allclose(tip, tip_ref, rtol=1e-3, atol=1e-3), \
        float(jnp.max(jnp.abs(tip - tip_ref)))

    print("KERNEL_OK")
</pallas_src>

<mosaic_0001>
module attributes {stable_mosaic.version = 11 : i64} {
  func.func @_fused_kernel(%arg0: i32, %arg1: memref<1x4x256xf32, #tpu.memory_space<vmem>>, %arg2: memref<25x256xf32, #tpu.memory_space<vmem>>, %arg3: memref<8x4xf32, #tpu.memory_space<vmem>>, %arg4: memref<8x1xf32, #tpu.memory_space<vmem>>, %arg5: memref<8x25xf32, #tpu.memory_space<vmem>>, %arg6: memref<8x1xf32, #tpu.memory_space<vmem>>, %arg7: memref<8x8xf32, #tpu.memory_space<vmem>>, %arg8: memref<8x1xf32, #tpu.memory_space<vmem>>, %arg9: memref<8x25xf32, #tpu.memory_space<vmem>>, %arg10: memref<8x1xf32, #tpu.memory_space<vmem>>, %arg11: memref<8x8xf32, #tpu.memory_space<vmem>>, %arg12: memref<8x1xf32, #tpu.memory_space<vmem>>, %arg13: memref<1x8x256xf32, #tpu.memory_space<vmem>>, %arg14: memref<1x8x256xf32, #tpu.memory_space<vmem>>) attributes {dimension_semantics = [#tpu.dimension_semantics<parallel>], iteration_bounds = array<i64: 2>, scalar_prefetch = 0 : i64, scratch_operands = 0 : i64, tpu.core_type = #tpu.core_type<tc>, window_params = [{transform_indices = @transform_0, window_bounds = array<i64: 1, 4, 256>}, {pipeline_mode = #tpu.pipeline_mode<synchronous>, transform_indices = @transform_1, window_bounds = array<i64: 25, 256>}, {pipeline_mode = #tpu.pipeline_mode<synchronous>, transform_indices = @transform_2, window_bounds = array<i64: 8, 4>}, {pipeline_mode = #tpu.pipeline_mode<synchronous>, transform_indices = @transform_3, window_bounds = array<i64: 8, 1>}, {pipeline_mode = #tpu.pipeline_mode<synchronous>, transform_indices = @transform_4, window_bounds = array<i64: 8, 25>}, {pipeline_mode = #tpu.pipeline_mode<synchronous>, transform_indices = @transform_5, window_bounds = array<i64: 8, 1>}, {pipeline_mode = #tpu.pipeline_mode<synchronous>, transform_indices = @transform_6, window_bounds = array<i64: 8, 8>}, {pipeline_mode = #tpu.pipeline_mode<synchronous>, transform_indices = @transform_7, window_bounds = array<i64: 8, 1>}, {pipeline_mode = #tpu.pipeline_mode<synchronous>, transform_indices = @transform_8, window_bounds = array<i64: 8, 25>}, {pipeline_mode = #tpu.pipeline_mode<synchronous>, transform_indices = @transform_9, window_bounds = array<i64: 8, 1>}, {pipeline_mode = #tpu.pipeline_mode<synchronous>, transform_indices = @transform_10, window_bounds = array<i64: 8, 8>}, {pipeline_mode = #tpu.pipeline_mode<synchronous>, transform_indices = @transform_11, window_bounds = array<i64: 8, 1>}, {transform_indices = @transform_12, window_bounds = array<i64: 1, 8, 256>}, {transform_indices = @transform_13, window_bounds = array<i64: 1, 8, 256>}]} {
    %c0 = arith.constant 0 : index
    %c0_0 = arith.constant 0 : index
    %c0_1 = arith.constant 0 : index
    %0 = vector.load %arg1[%c0, %c0_0, %c0_1] : memref<1x4x256xf32, #tpu.memory_space<vmem>>, vector<1x4x256xf32>
    %1 = vector.shape_cast %0 : vector<1x4x256xf32> to vector<4x256xf32>
    %c0_2 = arith.constant 0 : index
    %c0_3 = arith.constant 0 : index
    %2 = vector.load %arg2[%c0_2, %c0_3] : memref<25x256xf32, #tpu.memory_space<vmem>>, vector<25x256xf32>
    %c0_4 = arith.constant 0 : index
    %c0_5 = arith.constant 0 : index
    %3 = vector.load %arg3[%c0_4, %c0_5] : memref<8x4xf32, #tpu.memory_space<vmem>>, vector<8x4xf32>
    %c0_6 = arith.constant 0 : index
    %c0_7 = arith.constant 0 : index
    %4 = vector.load %arg4[%c0_6, %c0_7] : memref<8x1xf32, #tpu.memory_space<vmem>>, vector<8x1xf32>
    %5 = vector.shape_cast %4 : vector<8x1xf32> to vector<8x1xf32>
    %6 = vector.broadcast %5 : vector<8x1xf32> to vector<8x256xf32>
    %7 = vector.extract_strided_slice %3 {offsets = [0, 0], sizes = [8, 1], strides = [1, 1]} : vector<8x4xf32> to vector<8x1xf32>
    %8 = vector.extract_strided_slice %1 {offsets = [0, 0], sizes = [1, 256], strides = [1, 1]} : vector<4x256xf32> to vector<1x256xf32>
    %9 = vector.broadcast %7 : vector<8x1xf32> to vector<8x256xf32>
    %10 = vector.broadcast %8 : vector<1x256xf32> to vector<8x256xf32>
    %11 = arith.mulf %9, %10 : vector<8x256xf32>
    %12 = arith.addf %6, %11 : vector<8x256xf32>
    %13 = vector.extract_strided_slice %3 {offsets = [0, 1], sizes = [8, 1], strides = [1, 1]} : vector<8x4xf32> to vector<8x1xf32>
    %14 = vector.extract_strided_slice %1 {offsets = [1, 0], sizes = [1, 256], strides = [1, 1]} : vector<4x256xf32> to vector<1x256xf32>
    %15 = vector.broadcast %13 : vector<8x1xf32> to vector<8x256xf32>
    %16 = vector.broadcast %14 : vector<1x256xf32> to vector<8x256xf32>
    %17 = arith.mulf %15, %16 : vector<8x256xf32>
    %18 = arith.addf %12, %17 : vector<8x256xf32>
    %19 = vector.extract_strided_slice %3 {offsets = [0, 2], sizes = [8, 1], strides = [1, 1]} : vector<8x4xf32> to vector<8x1xf32>
    %20 = vector.extract_strided_slice %1 {offsets = [2, 0], sizes = [1, 256], strides = [1, 1]} : vector<4x256xf32> to vector<1x256xf32>
    %21 = vector.broadcast %19 : vector<8x1xf32> to vector<8x256xf32>
    %22 = vector.broadcast %20 : vector<1x256xf32> to vector<8x256xf32>
    %23 = arith.mulf %21, %22 : vector<8x256xf32>
    %24 = arith.addf %18, %23 : vector<8x256xf32>
    %25 = vector.extract_strided_slice %3 {offsets = [0, 3], sizes = [8, 1], strides = [1, 1]} : vector<8x4xf32> to vector<8x1xf32>
    %26 = vector.extract_strided_slice %1 {offsets = [3, 0], sizes = [1, 256], strides = [1, 1]} : vector<4x256xf32> to vector<1x256xf32>
    %27 = vector.broadcast %25 : vector<8x1xf32> to vector<8x256xf32>
    %28 = vector.broadcast %26 : vector<1x256xf32> to vector<8x256xf32>
    %29 = arith.mulf %27, %28 : vector<8x256xf32>
    %30 = arith.addf %24, %29 : vector<8x256xf32>
    %cst = arith.constant 1.000000e-01 : f32
    %31 = vector.broadcast %cst : f32 to vector<8x256xf32>
    %32 = arith.mulf %31, %30 : vector<8x256xf32>
    %33 = arith.maximumf %30, %32 : vector<8x256xf32>
    %c0_8 = arith.constant 0 : index
    %c0_9 = arith.constant 0 : index
    %34 = vector.load %arg5[%c0_8, %c0_9] : memref<8x25xf32, #tpu.memory_space<vmem>>, vector<8x25xf32>
    %c0_10 = arith.constant 0 : index
    %c0_11 = arith.constant 0 : index
    %35 = vector.load %arg6[%c0_10, %c0_11] : memref<8x1xf32, #tpu.memory_space<vmem>>, vector<8x1xf32>
    %36 = vector.shape_cast %35 : vector<8x1xf32> to vector<8x1xf32>
    %37 = vector.broadcast %36 : vector<8x1xf32> to vector<8x256xf32>
    %c34_i32 = arith.constant 34 : i32
    %38 = tpu.dynamic_rotate %33 by %c34_i32 dim 1 : vector<8x256xf32>, i32 -> vector<8x256xf32>
    %39 = vector.extract_strided_slice %34 {offsets = [0, 0], sizes = [8, 1], strides = [1, 1]} : vector<8x25xf32> to vector<8x1xf32>
    %40 = vector.broadcast %39 : vector<8x1xf32> to vector<8x256xf32>
    %41 = arith.mulf %38, %40 : vector<8x256xf32>
    %42 = vector.extract_strided_slice %2 {offsets = [0, 0], sizes = [1, 256], strides = [1, 1]} : vector<25x256xf32> to vector<1x256xf32>
    %43 = vector.broadcast %42 : vector<1x256xf32> to vector<8x256xf32>
    %44 = arith.mulf %41, %43 : vector<8x256xf32>
    %45 = arith.addf %37, %44 : vector<8x256xf32>
    %c33_i32 = arith.constant 33 : i32
    %46 = tpu.dynamic_rotate %33 by %c33_i32 dim 1 : vector<8x256xf32>, i32 -> vector<8x256xf32>
    %47 = vector.extract_strided_slice %34 {offsets = [0, 1], sizes = [8, 1], strides = [1, 1]} : vector<8x25xf32> to vector<8x1xf32>
    %48 = vector.broadcast %47 : vector<8x1xf32> to vector<8x256xf32>
    %49 = arith.mulf %46, %48 : vector<8x256xf32>
    %50 = vector.extract_strided_slice %2 {offsets = [1, 0], sizes = [1, 256], strides = [1, 1]} : vector<25x256xf32> to vector<1x256xf32>
    %51 = vector.broadcast %50 : vector<1x256xf32> to vector<8x256xf32>
    %52 = arith.mulf %49, %51 : vector<8x256xf32>
    %53 = arith.addf %45, %52 : vector<8x256xf32>
    %c32_i32 = arith.constant 32 : i32
    %54 = tpu.dynamic_rotate %33 by %c32_i32 dim 1 : vector<8x256xf32>, i32 -> vector<8x256xf32>
    %55 = vector.extract_strided_slice %34 {offsets = [0, 2], sizes = [8, 1], strides = [1, 1]} : vector<8x25xf32> to vector<8x1xf32>
    %56 = vector.broadcast %55 : vector<8x1xf32> to vector<8x256xf32>
    %57 = arith.mulf %54, %56 : vector<8x256xf32>
    %58 = vector.extract_strided_slice %2 {offsets = [2, 0], sizes = [1, 256], strides = [1, 1]} : vector<25x256xf32> to vector<1x256xf32>
    %59 = vector.broadcast %58 : vector<1x256xf32> to vector<8x256xf32>
    %60 = arith.mulf %57, %59 : vector<8x256xf32>
    %61 = arith.addf %53, %60 : vector<8x256xf32>
    %c31_i32 = arith.constant 31 : i32
    %62 = tpu.dynamic_rotate %33 by %c31_i32 dim 1 : vector<8x256xf32>, i32 -> vector<8x256xf32>
    %63 = vector.extract_strided_slice %34 {offsets = [0, 3], sizes = [8, 1], strides = [1, 1]} : vector<8x25xf32> to vector<8x1xf32>
    %64 = vector.broadcast %63 : vector<8x1xf32> to vector<8x256xf32>
    %65 = arith.mulf %62, %64 : vector<8x256xf32>
    %66 = vector.extract_strided_slice %2 {offsets = [3, 0], sizes = [1, 256], strides = [1, 1]} : vector<25x256xf32> to vector<1x256xf32>
    %67 = vector.broadcast %66 : vector<1x256xf32> to vector<8x256xf32>
    %68 = arith.mulf %65, %67 : vector<8x256xf32>
    %69 = arith.addf %61, %68 : vector<8x256xf32>
    %c30_i32 = arith.constant 30 : i32
    %70 = tpu.dynamic_rotate %33 by %c30_i32 dim 1 : vector<8x256xf32>, i32 -> vector<8x256xf32>
    %71 = vector.extract_strided_slice %34 {offsets = [0, 4], sizes = [8, 1], strides = [1, 1]} : vector<8x25xf32> to vector<8x1xf32>
    %72 = vector.broadcast %71 : vector<8x1xf32> to vector<8x256xf32>
    %73 = arith.mulf %70, %72 : vector<8x256xf32>
    %74 = vector.extract_strided_slice %2 {offsets = [4, 0], sizes = [1, 256], strides = [1, 1]} : vector<25x256xf32> to vector<1x256xf32>
    %75 = vector.broadcast %74 : vector<1x256xf32> to vector<8x256xf32>
    %76 = arith.mulf %73, %75 : vector<8x256xf32>
    %77 = arith.addf %69, %76 : vector<8x256xf32>
    %c18_i32 = arith.constant 18 : i32
    %78 = tpu.dynamic_rotate %33 by %c18_i32 dim 1 : vector<8x256xf32>, i32 -> vector<8x256xf32>
    %79 = vector.extract_strided_slice %34 {offsets = [0, 5], sizes = [8, 1], strides = [1, 1]} : vector<8x25xf32> to vector<8x1xf32>
    %80 = vector.broadcast %79 : vector<8x1xf32> to vector<8x256xf32>
    %81 = arith.mulf %78, %80 : vector<8x256xf32>
    %82 = vector.extract_strided_slice %2 {offsets = [5, 0], sizes = [1, 256], strides = [1, 1]} : vector<25x256xf32> to vector<1x256xf32>
    %83 = vector.broadcast %82 : vector<1x256xf32> to vector<8x256xf32>
    %84 = arith.mulf %81, %83 : vector<8x256xf32>
    %85 = arith.addf %77, %84 : vector<8x256xf32>
    %c17_i32 = arith.constant 17 : i32
    %86 = tpu.dynamic_rotate %33 by %c17_i32 dim 1 : vector<8x256xf32>, i32 -> vector<8x256xf32>
    %87 = vector.extract_strided_slice %34 {offsets = [0, 6], sizes = [8, 1], strides = [1, 1]} : vector<8x25xf32> to vector<8x1xf32>
    %88 = vector.broadcast %87 : vector<8x1xf32> to vector<8x256xf32>
    %89 = arith.mulf %86, %88 : vector<8x256xf32>
    %90 = vector.extract_strided_slice %2 {offsets = [6, 0], sizes = [1, 256], strides = [1, 1]} : vector<25x256xf32> to vector<1x256xf32>
    %91 = vector.broadcast %90 : vector<1x256xf32> to vector<8x256xf32>
    %92 = arith.mulf %89, %91 : vector<8x256xf32>
    %93 = arith.addf %85, %92 : vector<8x256xf32>
    %c16_i32 = arith.constant 16 : i32
    %94 = tpu.dynamic_rotate %33 by %c16_i32 dim 1 : vector<8x256xf32>, i32 -> vector<8x256xf32>
    %95 = vector.extract_strided_slice %34 {offsets = [0, 7], sizes = [8, 1], strides = [1, 1]} : vector<8x25xf32> to vector<8x1xf32>
    %96 = vector.broadcast %95 : vector<8x1xf32> to vector<8x256xf32>
    %97 = arith.mulf %94, %96 : vector<8x256xf32>
    %98 = vector.extract_strided_slice %2 {offsets = [7, 0], sizes = [1, 256], strides = [1, 1]} : vector<25x256xf32> to vector<1x256xf32>
    %99 = vector.broadcast %98 : vector<1x256xf32> to vector<8x256xf32>
    %100 = arith.mulf %97, %99 : vector<8x256xf32>
    %101 = arith.addf %93, %100 : vector<8x256xf32>
    %c15_i32 = arith.constant 15 : i32
    %102 = tpu.dynamic_rotate %33 by %c15_i32 dim 1 : vector<8x256xf32>, i32 -> vector<8x256xf32>
    %103 = vector.extract_strided_slice %34 {offsets = [0, 8], sizes = [8, 1], strides = [1, 1]} : vector<8x25xf32> to vector<8x1xf32>
    %104 = vector.broadcast %103 : vector<8x1xf32> to vector<8x256xf32>
    %105 = arith.mulf %102, %104 : vector<8x256xf32>
    %106 = vector.extract_strided_slice %2 {offsets = [8, 0], sizes = [1, 256], strides = [1, 1]} : vector<25x256xf32> to vector<1x256xf32>
    %107 = vector.broadcast %106 : vector<1x256xf32> to vector<8x256xf32>
    %108 = arith.mulf %105, %107 : vector<8x256xf32>
    %109 = arith.addf %101, %108 : vector<8x256xf32>
    %c14_i32 = arith.constant 14 : i32
    %110 = tpu.dynamic_rotate %33 by %c14_i32 dim 1 : vector<8x256xf32>, i32 -> vector<8x256xf32>
    %111 = vector.extract_strided_slice %34 {offsets = [0, 9], sizes = [8, 1], strides = [1, 1]} : vector<8x25xf32> to vector<8x1xf32>
    %112 = vector.broadcast %111 : vector<8x1xf32> to vector<8x256xf32>
    %113 = arith.mulf %110, %112 : vector<8x256xf32>
    %114 = vector.extract_strided_slice %2 {offsets = [9, 0], sizes = [1, 256], strides = [1, 1]} : vector<25x256xf32> to vector<1x256xf32>
    %115 = vector.broadcast %114 : vector<1x256xf32> to vector<8x256xf32>
    %116 = arith.mulf %113, %115 : vector<8x256xf32>
    %117 = arith.addf %109, %116 : vector<8x256xf32>
    %c2_i32 = arith.constant 2 : i32
    %118 = tpu.dynamic_rotate %33 by %c2_i32 dim 1 : vector<8x256xf32>, i32 -> vector<8x256xf32>
    %119 = vector.extract_strided_slice %34 {offsets = [0, 10], sizes = [8, 1], strides = [1, 1]} : vector<8x25xf32> to vector<8x1xf32>
    %120 = vector.broadcast %119 : vector<8x1xf32> to vector<8x256xf32>
    %121 = arith.mulf %118, %120 : vector<8x256xf32>
    %122 = vector.extract_strided_slice %2 {offsets = [10, 0], sizes = [1, 256], strides = [1, 1]} : vector<25x256xf32> to vector<1x256xf32>
    %123 = vector.broadcast %122 : vector<1x256xf32> to vector<8x256xf32>
    %124 = arith.mulf %121, %123 : vector<8x256xf32>
    %125 = arith.addf %117, %124 : vector<8x256xf32>
    %c1_i32 = arith.constant 1 : i32
    %126 = tpu.dynamic_rotate %33 by %c1_i32 dim 1 : vector<8x256xf32>, i32 -> vector<8x256xf32>
    %127 = vector.extract_strided_slice %34 {offsets = [0, 11], sizes = [8, 1], strides = [1, 1]} : vector<8x25xf32> to vector<8x1xf32>
    %128 = vector.broadcast %127 : vector<8x1xf32> to vector<8x256xf32>
    %129 = arith.mulf %126, %128 : vector<8x256xf32>
    %130 = vector.extract_strided_slice %2 {offsets = [11, 0], sizes = [1, 256], strides = [1, 1]} : vector<25x256xf32> to vector<1x256xf32>
    %131 = vector.broadcast %130 : vector<1x256xf32> to vector<8x256xf32>
    %132 = arith.mulf %129, %131 : vector<8x256xf32>
    %133 = arith.addf %125, %132 : vector<8x256xf32>
    %134 = vector.extract_strided_slice %34 {offsets = [0, 12], sizes = [8, 1], strides = [1, 1]} : vector<8x25xf32> to vector<8x1xf32>
    %135 = vector.broadcast %134 : vector<8x1xf32> to vector<8x256xf32>
    %136 = arith.mulf %33, %135 : vector<8x256xf32>
    %137 = arith.addf %133, %136 : vector<8x256xf32>
    %c255_i32 = arith.constant 255 : i32
    %138 = tpu.dynamic_rotate %33 by %c255_i32 dim 1 : vector<8x256xf32>, i32 -> vector<8x256xf32>
    %139 = vector.extract_strided_slice %34 {offsets = [0, 13], sizes = [8, 1], strides = [1, 1]} : vector<8x25xf32> to vector<8x1xf32>
    %140 = vector.broadcast %139 : vector<8x1xf32> to vector<8x256xf32>
    %141 = arith.mulf %138, %140 : vector<8x256xf32>
    %142 = vector.extract_strided_slice %2 {offsets = [13, 0], sizes = [1, 256], strides = [1, 1]} : vector<25x256xf32> to vector<1x256xf32>
    %143 = vector.broadcast %142 : vector<1x256xf32> to vector<8x256xf32>
    %144 = arith.mulf %141, %143 : vector<8x256xf32>
    %145 = arith.addf %137, %144 : vector<8x256xf32>
    %c254_i32 = arith.constant 254 : i32
    %146 = tpu.dynamic_rotate %33 by %c254_i32 dim 1 : vector<8x256xf32>, i32 -> vector<8x256xf32>
    %147 = vector.extract_strided_slice %34 {offsets = [0, 14], sizes = [8, 1], strides = [1, 1]} : vector<8x25xf32> to vector<8x1xf32>
    %148 = vector.broadcast %147 : vector<8x1xf32> to vector<8x256xf32>
    %149 = arith.mulf %146, %148 : vector<8x256xf32>
    %150 = vector.extract_strided_slice %2 {offsets = [14, 0], sizes = [1, 256], strides = [1, 1]} : vector<25x256xf32> to vector<1x256xf32>
    %151 = vector.broadcast %150 : vector<1x256xf32> to vector<8x256xf32>
    %152 = arith.mulf %149, %151 : vector<8x256xf32>
    %153 = arith.addf %145, %152 : vector<8x256xf32>
    %c242_i32 = arith.constant 242 : i32
    %154 = tpu.dynamic_rotate %33 by %c242_i32 dim 1 : vector<8x256xf32>, i32 -> vector<8x256xf32>
    %155 = vector.extract_strided_slice %34 {offsets = [0, 15], sizes = [8, 1], strides = [1, 1]} : vector<8x25xf32> to vector<8x1xf32>
    %156 = vector.broadcast %155 : vector<8x1xf32> to vector<8x256xf32>
    %157 = arith.mulf %154, %156 : vector<8x256xf32>
    %158 = vector.extract_strided_slice %2 {offsets = [15, 0], sizes = [1, 256], strides = [1, 1]} : vector<25x256xf32> to vector<1x256xf32>
    %159 = vector.broadcast %158 : vector<1x256xf32> to vector<8x256xf32>
    %160 = arith.mulf %157, %159 : vector<8x256xf32>
    %161 = arith.addf %153, %160 : vector<8x256xf32>
    %c241_i32 = arith.constant 241 : i32
    %162 = tpu.dynamic_rotate %33 by %c241_i32 dim 1 : vector<8x256xf32>, i32 -> vector<8x256xf32>
    %163 = vector.extract_strided_slice %34 {offsets = [0, 16], sizes = [8, 1], strides = [1, 1]} : vector<8x25xf32> to vector<8x1xf32>
    %164 = vector.broadcast %163 : vector<8x1xf32> to vector<8x256xf32>
    %165 = arith.mulf %162, %164 : vector<8x256xf32>
    %166 = vector.extract_strided_slice %2 {offsets = [16, 0], sizes = [1, 256], strides = [1, 1]} : vector<25x256xf32> to vector<1x256xf32>
    %167 = vector.broadcast %166 : vector<1x256xf32> to vector<8x256xf32>
    %168 = arith.mulf %165, %167 : vector<8x256xf32>
    %169 = arith.addf %161, %168 : vector<8x256xf32>
    %c240_i32 = arith.constant 240 : i32
    %170 = tpu.dynamic_rotate %33 by %c240_i32 dim 1 : vector<8x256xf32>, i32 -> vector<8x256xf32>
    %171 = vector.extract_strided_slice %34 {offsets = [0, 17], sizes = [8, 1], strides = [1, 1]} : vector<8x25xf32> to vector<8x1xf32>
    %172 = vector.broadcast %171 : vector<8x1xf32> to vector<8x256xf32>
    %173 = arith.mulf %170, %172 : vector<8x256xf32>
    %174 = vector.extract_strided_slice %2 {offsets = [17, 0], sizes = [1, 256], strides = [1, 1]} : vector<25x256xf32> to vector<1x256xf32>
    %175 = vector.broadcast %174 : vector<1x256xf32> to vector<8x256xf32>
    %176 = arith.mulf %173, %175 : vector<8x256xf32>
    %177 = arith.addf %169, %176 : vector<8x256xf32>
    %c239_i32 = arith.constant 239 : i32
    %178 = tpu.dynamic_rotate %33 by %c239_i32 dim 1 : vector<8x256xf32>, i32 -> vector<8x256xf32>
    %179 = vector.extract_strided_slice %34 {offsets = [0, 18], sizes = [8, 1], strides = [1, 1]} : vector<8x25xf32> to vector<8x1xf32>
    %180 = vector.broadcast %179 : vector<8x1xf32> to vector<8x256xf32>
    %181 = arith.mulf %178, %180 : vector<8x256xf32>
    %182 = vector.extract_strided_slice %2 {offsets = [18, 0], sizes = [1, 256], strides = [1, 1]} : vector<25x256xf32> to vector<1x256xf32>
    %183 = vector.broadcast %182 : vector<1x256xf32> to vector<8x256xf32>
    %184 = arith.mulf %181, %183 : vector<8x256xf32>
    %185 = arith.addf %177, %184 : vector<8x256xf32>
    %c238_i32 = arith.constant 238 : i32
    %186 = tpu.dynamic_rotate %33 by %c238_i32 dim 1 : vector<8x256xf32>, i32 -> vector<8x256xf32>
    %187 = vector.extract_strided_slice %34 {offsets = [0, 19], sizes = [8, 1], strides = [1, 1]} : vector<8x25xf32> to vector<8x1xf32>
    %188 = vector.broadcast %187 : vector<8x1xf32> to vector<8x256xf32>
    %189 = arith.mulf %186, %188 : vector<8x256xf32>
    %190 = vector.extract_strided_slice %2 {offsets = [19, 0], sizes = [1, 256], strides = [1, 1]} : vector<25x256xf32> to vector<1x256xf32>
    %191 = vector.broadcast %190 : vector<1x256xf32> to vector<8x256xf32>
    %192 = arith.mulf %189, %191 : vector<8x256xf32>
    %193 = arith.addf %185, %192 : vector<8x256xf32>
    %c226_i32 = arith.constant 226 : i32
    %194 = tpu.dynamic_rotate %33 by %c226_i32 dim 1 : vector<8x256xf32>, i32 -> vector<8x256xf32>
    %195 = vector.extract_strided_slice %34 {offsets = [0, 20], sizes = [8, 1], strides = [1, 1]} : vector<8x25xf32> to vector<8x1xf32>
    %196 = vector.broadcast %195 : vector<8x1xf32> to vector<8x256xf32>
    %197 = arith.mulf %194, %196 : vector<8x256xf32>
    %198 = vector.extract_strided_slice %2 {offsets = [20, 0], sizes = [1, 256], strides = [1, 1]} : vector<25x256xf32> to vector<1x256xf32>
    %199 = vector.broadcast %198 : vector<1x256xf32> to vector<8x256xf32>
    %200 = arith.mulf %197, %199 : vector<8x256xf32>
    %201 = arith.addf %193, %200 : vector<8x256xf32>
    %c225_i32 = arith.constant 225 : i32
    %202 = tpu.dynamic_rotate %33 by %c225_i32 dim 1 : vector<8x256xf32>, i32 -> vector<8x256xf32>
    %203 = vector.extract_strided_slice %34 {offsets = [0, 21], sizes = [8, 1], strides = [1, 1]} : vector<8x25xf32> to vector<8x1xf32>
    %204 = vector.broadcast %203 : vector<8x1xf32> to vector<8x256xf32>
    %205 = arith.mulf %202, %204 : vector<8x256xf32>
    %206 = vector.extract_strided_slice %2 {offsets = [21, 0], sizes = [1, 256], strides = [1, 1]} : vector<25x256xf32> to vector<1x256xf32>
    %207 = vector.broadcast %206 : vector<1x256xf32> to vector<8x256xf32>
    %208 = arith.mulf %205, %207 : vector<8x256xf32>
    %209 = arith.addf %201, %208 : vector<8x256xf32>
    %c224_i32 = arith.constant 224 : i32
    %210 = tpu.dynamic_rotate %33 by %c224_i32 dim 1 : vector<8x256xf32>, i32 -> vector<8x256xf32>
    %211 = vector.extract_strided_slice %34 {offsets = [0, 22], sizes = [8, 1], strides = [1, 1]} : vector<8x25xf32> to vector<8x1xf32>
    %212 = vector.broadcast %211 : vector<8x1xf32> to vector<8x256xf32>
    %213 = arith.mulf %210, %212 : vector<8x256xf32>
    %214 = vector.extract_strided_slice %2 {offsets = [22, 0], sizes = [1, 256], strides = [1, 1]} : vector<25x256xf32> to vector<1x256xf32>
    %215 = vector.broadcast %214 : vector<1x256xf32> to vector<8x256xf32>
    %216 = arith.mulf %213, %215 : vector<8x256xf32>
    %217 = arith.addf %209, %216 : vector<8x256xf32>
    %c223_i32 = arith.constant 223 : i32
    %218 = tpu.dynamic_rotate %33 by %c223_i32 dim 1 : vector<8x256xf32>, i32 -> vector<8x256xf32>
    %219 = vector.extract_strided_slice %34 {offsets = [0, 23], sizes = [8, 1], strides = [1, 1]} : vector<8x25xf32> to vector<8x1xf32>
    %220 = vector.broadcast %219 : vector<8x1xf32> to vector<8x256xf32>
    %221 = arith.mulf %218, %220 : vector<8x256xf32>
    %222 = vector.extract_strided_slice %2 {offsets = [23, 0], sizes = [1, 256], strides = [1, 1]} : vector<25x256xf32> to vector<1x256xf32>
    %223 = vector.broadcast %222 : vector<1x256xf32> to vector<8x256xf32>
    %224 = arith.mulf %221, %223 : vector<8x256xf32>
    %225 = arith.addf %217, %224 : vector<8x256xf32>
    %c222_i32 = arith.constant 222 : i32
    %226 = tpu.dynamic_rotate %33 by %c222_i32 dim 1 : vector<8x256xf32>, i32 -> vector<8x256xf32>
    %227 = vector.extract_strided_slice %34 {offsets = [0, 24], sizes = [8, 1], strides = [1, 1]} : vector<8x25xf32> to vector<8x1xf32>
    %228 = vector.broadcast %227 : vector<8x1xf32> to vector<8x256xf32>
    %229 = arith.mulf %226, %228 : vector<8x256xf32>
    %230 = vector.extract_strided_slice %2 {offsets = [24, 0], sizes = [1, 256], strides = [1, 1]} : vector<25x256xf32> to vector<1x256xf32>
    %231 = vector.broadcast %230 : vector<1x256xf32> to vector<8x256xf32>
    %232 = arith.mulf %229, %231 : vector<8x256xf32>
    %233 = arith.addf %225, %232 : vector<8x256xf32>
    %cst_12 = arith.constant 1.000000e-01 : f32
    %234 = vector.broadcast %cst_12 : f32 to vector<8x256xf32>
    %235 = arith.mulf %234, %233 : vector<8x256xf32>
    %236 = arith.maximumf %233, %235 : vector<8x256xf32>
    %c0_13 = arith.constant 0 : index
    %c0_14 = arith.constant 0 : index
    %237 = vector.load %arg7[%c0_13, %c0_14] : memref<8x8xf32, #tpu.memory_space<vmem>>, vector<8x8xf32>
    %c0_15 = arith.constant 0 : index
    %c0_16 = arith.constant 0 : index
    %238 = vector.load %arg8[%c0_15, %c0_16] : memref<8x1xf32, #tpu.memory_space<vmem>>, vector<8x1xf32>
    %239 = vector.shape_cast %238 : vector<8x1xf32> to vector<8x1xf32>
    %240 = vector.broadcast %239 : vector<8x1xf32> to vector<8x256xf32>
    %241 = vector.extract_strided_slice %237 {offsets = [0, 0], sizes = [8, 1], strides = [1, 1]} : vector<8x8xf32> to vector<8x1xf32>
    %242 = vector.extract_strided_slice %236 {offsets = [0, 0], sizes = [1, 256], strides = [1, 1]} : vector<8x256xf32> to vector<1x256xf32>
    %243 = vector.broadcast %241 : vector<8x1xf32> to vector<8x256xf32>
    %244 = vector.broadcast %242 : vector<1x256xf32> to vector<8x256xf32>
    %245 = arith.mulf %243, %244 : vector<8x256xf32>
    %246 = arith.addf %240, %245 : vector<8x256xf32>
    %247 = vector.extract_strided_slice %237 {offsets = [0, 1], sizes = [8, 1], strides = [1, 1]} : vector<8x8xf32> to vector<8x1xf32>
    %248 = vector.extract_strided_slice %236 {offsets = [1, 0], sizes = [1, 256], strides = [1, 1]} : vector<8x256xf32> to vector<1x256xf32>
    %249 = vector.broadcast %247 : vector<8x1xf32> to vector<8x256xf32>
    %250 = vector.broadcast %248 : vector<1x256xf32> to vector<8x256xf32>
    %251 = arith.mulf %249, %250 : vector<8x256xf32>
    %252 = arith.addf %246, %251 : vector<8x256xf32>
    %253 = vector.extract_strided_slice %237 {offsets = [0, 2], sizes = [8, 1], strides = [1, 1]} : vector<8x8xf32> to vector<8x1xf32>
    %254 = vector.extract_strided_slice %236 {offsets = [2, 0], sizes = [1, 256], strides = [1, 1]} : vector<8x256xf32> to vector<1x256xf32>
    %255 = vector.broadcast %253 : vector<8x1xf32> to vector<8x256xf32>
    %256 = vector.broadcast %254 : vector<1x256xf32> to vector<8x256xf32>
    %257 = arith.mulf %255, %256 : vector<8x256xf32>
    %258 = arith.addf %252, %257 : vector<8x256xf32>
    %259 = vector.extract_strided_slice %237 {offsets = [0, 3], sizes = [8, 1], strides = [1, 1]} : vector<8x8xf32> to vector<8x1xf32>
    %260 = vector.extract_strided_slice %236 {offsets = [3, 0], sizes = [1, 256], strides = [1, 1]} : vector<8x256xf32> to vector<1x256xf32>
    %261 = vector.broadcast %259 : vector<8x1xf32> to vector<8x256xf32>
    %262 = vector.broadcast %260 : vector<1x256xf32> to vector<8x256xf32>
    %263 = arith.mulf %261, %262 : vector<8x256xf32>
    %264 = arith.addf %258, %263 : vector<8x256xf32>
    %265 = vector.extract_strided_slice %237 {offsets = [0, 4], sizes = [8, 1], strides = [1, 1]} : vector<8x8xf32> to vector<8x1xf32>
    %266 = vector.extract_strided_slice %236 {offsets = [4, 0], sizes = [1, 256], strides = [1, 1]} : vector<8x256xf32> to vector<1x256xf32>
    %267 = vector.broadcast %265 : vector<8x1xf32> to vector<8x256xf32>
    %268 = vector.broadcast %266 : vector<1x256xf32> to vector<8x256xf32>
    %269 = arith.mulf %267, %268 : vector<8x256xf32>
    %270 = arith.addf %264, %269 : vector<8x256xf32>
    %271 = vector.extract_strided_slice %237 {offsets = [0, 5], sizes = [8, 1], strides = [1, 1]} : vector<8x8xf32> to vector<8x1xf32>
    %272 = vector.extract_strided_slice %236 {offsets = [5, 0], sizes = [1, 256], strides = [1, 1]} : vector<8x256xf32> to vector<1x256xf32>
    %273 = vector.broadcast %271 : vector<8x1xf32> to vector<8x256xf32>
    %274 = vector.broadcast %272 : vector<1x256xf32> to vector<8x256xf32>
    %275 = arith.mulf %273, %274 : vector<8x256xf32>
    %276 = arith.addf %270, %275 : vector<8x256xf32>
    %277 = vector.extract_strided_slice %237 {offsets = [0, 6], sizes = [8, 1], strides = [1, 1]} : vector<8x8xf32> to vector<8x1xf32>
    %278 = vector.extract_strided_slice %236 {offsets = [6, 0], sizes = [1, 256], strides = [1, 1]} : vector<8x256xf32> to vector<1x256xf32>
    %279 = vector.broadcast %277 : vector<8x1xf32> to vector<8x256xf32>
    %280 = vector.broadcast %278 : vector<1x256xf32> to vector<8x256xf32>
    %281 = arith.mulf %279, %280 : vector<8x256xf32>
    %282 = arith.addf %276, %281 : vector<8x256xf32>
    %283 = vector.extract_strided_slice %237 {offsets = [0, 7], sizes = [8, 1], strides = [1, 1]} : vector<8x8xf32> to vector<8x1xf32>
    %284 = vector.extract_strided_slice %236 {offsets = [7, 0], sizes = [1, 256], strides = [1, 1]} : vector<8x256xf32> to vector<1x256xf32>
    %285 = vector.broadcast %283 : vector<8x1xf32> to vector<8x256xf32>
    %286 = vector.broadcast %284 : vector<1x256xf32> to vector<8x256xf32>
    %287 = arith.mulf %285, %286 : vector<8x256xf32>
    %288 = arith.addf %282, %287 : vector<8x256xf32>
    %cst_17 = arith.constant 1.000000e-01 : f32
    %289 = vector.broadcast %cst_17 : f32 to vector<8x256xf32>
    %290 = arith.mulf %289, %288 : vector<8x256xf32>
    %291 = arith.maximumf %288, %290 : vector<8x256xf32>
    %c0_18 = arith.constant 0 : index
    %c0_19 = arith.constant 0 : index
    %292 = vector.load %arg9[%c0_18, %c0_19] : memref<8x25xf32, #tpu.memory_space<vmem>>, vector<8x25xf32>
    %c0_20 = arith.constant 0 : index
    %c0_21 = arith.constant 0 : index
    %293 = vector.load %arg10[%c0_20, %c0_21] : memref<8x1xf32, #tpu.memory_space<vmem>>, vector<8x1xf32>
    %294 = vector.shape_cast %293 : vector<8x1xf32> to vector<8x1xf32>
    %295 = vector.broadcast %294 : vector<8x1xf32> to vector<8x256xf32>
    %c34_i32_22 = arith.constant 34 : i32
    %296 = tpu.dynamic_rotate %291 by %c34_i32_22 dim 1 : vector<8x256xf32>, i32 -> vector<8x256xf32>
    %297 = vector.extract_strided_slice %292 {offsets = [0, 0], sizes = [8, 1], strides = [1, 1]} : vector<8x25xf32> to vector<8x1xf32>
    %298 = vector.broadcast %297 : vector<8x1xf32> to vector<8x256xf32>
    %299 = arith.mulf %296, %298 : vector<8x256xf32>
    %300 = vector.extract_strided_slice %2 {offsets = [0, 0], sizes = [1, 256], strides = [1, 1]} : vector<25x256xf32> to vector<1x256xf32>
    %301 = vector.broadcast %300 : vector<1x256xf32> to vector<8x256xf32>
    %302 = arith.mulf %299, %301 : vector<8x256xf32>
    %303 = arith.addf %295, %302 : vector<8x256xf32>
    %c33_i32_23 = arith.constant 33 : i32
    %304 = tpu.dynamic_rotate %291 by %c33_i32_23 dim 1 : vector<8x256xf32>, i32 -> vector<8x256xf32>
    %305 = vector.extract_strided_slice %292 {offsets = [0, 1], sizes = [8, 1], strides = [1, 1]} : vector<8x25xf32> to vector<8x1xf32>
    %306 = vector.broadcast %305 : vector<8x1xf32> to vector<8x256xf32>
    %307 = arith.mulf %304, %306 : vector<8x256xf32>
    %308 = vector.extract_strided_slice %2 {offsets = [1, 0], sizes = [1, 256], strides = [1, 1]} : vector<25x256xf32> to vector<1x256xf32>
    %309 = vector.broadcast %308 : vector<1x256xf32> to vector<8x256xf32>
    %310 = arith.mulf %307, %309 : vector<8x256xf32>
    %311 = arith.addf %303, %310 : vector<8x256xf32>
    %c32_i32_24 = arith.constant 32 : i32
    %312 = tpu.dynamic_rotate %291 by %c32_i32_24 dim 1 : vector<8x256xf32>, i32 -> vector<8x256xf32>
    %313 = vector.extract_strided_slice %292 {offsets = [0, 2], sizes = [8, 1], strides = [1, 1]} : vector<8x25xf32> to vector<8x1xf32>
    %314 = vector.broadcast %313 : vector<8x1xf32> to vector<8x256xf32>
    %315 = arith.mulf %312, %314 : vector<8x256xf32>
    %316 = vector.extract_strided_slice %2 {offsets = [2, 0], sizes = [1, 256], strides = [1, 1]} : vector<25x256xf32> to vector<1x256xf32>
    %317 = vector.broadcast %316 : vector<1x256xf32> to vector<8x256xf32>
    %318 = arith.mulf %315, %317 : vector<8x256xf32>
    %319 = arith.addf %311, %318 : vector<8x256xf32>
    %c31_i32_25 = arith.constant 31 : i32
    %320 = tpu.dynamic_rotate %291 by %c31_i32_25 dim 1 : vector<8x256xf32>, i32 -> vector<8x256xf32>
    %321 = vector.extract_strided_slice %292 {offsets = [0, 3], sizes = [8, 1], strides = [1, 1]} : vector<8x25xf32> to vector<8x1xf32>
    %322 = vector.broadcast %321 : vector<8x1xf32> to vector<8x256xf32>
    %323 = arith.mulf %320, %322 : vector<8x256xf32>
    %324 = vector.extract_strided_slice %2 {offsets = [3, 0], sizes = [1, 256], strides = [1, 1]} : vector<25x256xf32> to vector<1x256xf32>
    %325 = vector.broadcast %324 : vector<1x256xf32> to vector<8x256xf32>
    %326 = arith.mulf %323, %325 : vector<8x256xf32>
    %327 = arith.addf %319, %326 : vector<8x256xf32>
    %c30_i32_26 = arith.constant 30 : i32
    %328 = tpu.dynamic_rotate %291 by %c30_i32_26 dim 1 : vector<8x256xf32>, i32 -> vector<8x256xf32>
    %329 = vector.extract_strided_slice %292 {offsets = [0, 4], sizes = [8, 1], strides = [1, 1]} : vector<8x25xf32> to vector<8x1xf32>
    %330 = vector.broadcast %329 : vector<8x1xf32> to vector<8x256xf32>
    %331 = arith.mulf %328, %330 : vector<8x256xf32>
    %332 = vector.extract_strided_slice %2 {offsets = [4, 0], sizes = [1, 256], strides = [1, 1]} : vector<25x256xf32> to vector<1x256xf32>
    %333 = vector.broadcast %332 : vector<1x256xf32> to vector<8x256xf32>
    %334 = arith.mulf %331, %333 : vector<8x256xf32>
    %335 = arith.addf %327, %334 : vector<8x256xf32>
    %c18_i32_27 = arith.constant 18 : i32
    %336 = tpu.dynamic_rotate %291 by %c18_i32_27 dim 1 : vector<8x256xf32>, i32 -> vector<8x256xf32>
    %337 = vector.extract_strided_slice %292 {offsets = [0, 5], sizes = [8, 1], strides = [1, 1]} : vector<8x25xf32> to vector<8x1xf32>
    %338 = vector.broadcast %337 : vector<8x1xf32> to vector<8x256xf32>
    %339 = arith.mulf %336, %338 : vector<8x256xf32>
    %340 = vector.extract_strided_slice %2 {offsets = [5, 0], sizes = [1, 256], strides = [1, 1]} : vector<25x256xf32> to vector<1x256xf32>
    %341 = vector.broadcast %340 : vector<1x256xf32> to vector<8x256xf32>
    %342 = arith.mulf %339, %341 : vector<8x256xf32>
    %343 = arith.addf %335, %342 : vector<8x256xf32>
    %c17_i32_28 = arith.constant 17 : i32
    %344 = tpu.dynamic_rotate %291 by %c17_i32_28 dim 1 : vector<8x256xf32>, i32 -> vector<8x256xf32>
    %345 = vector.extract_strided_slice %292 {offsets = [0, 6], sizes = [8, 1], strides = [1, 1]} : vector<8x25xf32> to vector<8x1xf32>
    %346 = vector.broadcast %345 : vector<8x1xf32> to vector<8x256xf32>
    %347 = arith.mulf %344, %346 : vector<8x256xf32>
    %348 = vector.extract_strided_slice %2 {offsets = [6, 0], sizes = [1, 256], strides = [1, 1]} : vector<25x256xf32> to vector<1x256xf32>
    %349 = vector.broadcast %348 : vector<1x256xf32> to vector<8x256xf32>
    %350 = arith.mulf %347, %349 : vector<8x256xf32>
    %351 = arith.addf %343, %350 : vector<8x256xf32>
    %c16_i32_29 = arith.constant 16 : i32
    %352 = tpu.dynamic_rotate %291 by %c16_i32_29 dim 1 : vector<8x256xf32>, i32 -> vector<8x256xf32>
    %353 = vector.extract_strided_slice %292 {offsets = [0, 7], sizes = [8, 1], strides = [1, 1]} : vector<8x25xf32> to vector<8x1xf32>
    %354 = vector.broadcast %353 : vector<8x1xf32> to vector<8x256xf32>
    %355 = arith.mulf %352, %354 : vector<8x256xf32>
    %356 = vector.extract_strided_slice %2 {offsets = [7, 0], sizes = [1, 256], strides = [1, 1]} : vector<25x256xf32> to vector<1x256xf32>
    %357 = vector.broadcast %356 : vector<1x256xf32> to vector<8x256xf32>
    %358 = arith.mulf %355, %357 : vector<8x256xf32>
    %359 = arith.addf %351, %358 : vector<8x256xf32>
    %c15_i32_30 = arith.constant 15 : i32
    %360 = tpu.dynamic_rotate %291 by %c15_i32_30 dim 1 : vector<8x256xf32>, i32 -> vector<8x256xf32>
    %361 = vector.extract_strided_slice %292 {offsets = [0, 8], sizes = [8, 1], strides = [1, 1]} : vector<8x25xf32> to vector<8x1xf32>
    %362 = vector.broadcast %361 : vector<8x1xf32> to vector<8x256xf32>
    %363 = arith.mulf %360, %362 : vector<8x256xf32>
    %364 = vector.extract_strided_slice %2 {offsets = [8, 0], sizes = [1, 256], strides = [1, 1]} : vector<25x256xf32> to vector<1x256xf32>
    %365 = vector.broadcast %364 : vector<1x256xf32> to vector<8x256xf32>
    %366 = arith.mulf %363, %365 : vector<8x256xf32>
    %367 = arith.addf %359, %366 : vector<8x256xf32>
    %c14_i32_31 = arith.constant 14 : i32
    %368 = tpu.dynamic_rotate %291 by %c14_i32_31 dim 1 : vector<8x256xf32>, i32 -> vector<8x256xf32>
    %369 = vector.extract_strided_slice %292 {offsets = [0, 9], sizes = [8, 1], strides = [1, 1]} : vector<8x25xf32> to vector<8x1xf32>
    %370 = vector.broadcast %369 : vector<8x1xf32> to vector<8x256xf32>
    %371 = arith.mulf %368, %370 : vector<8x256xf32>
    %372 = vector.extract_strided_slice %2 {offsets = [9, 0], sizes = [1, 256], strides = [1, 1]} : vector<25x256xf32> to vector<1x256xf32>
    %373 = vector.broadcast %372 : vector<1x256xf32> to vector<8x256xf32>
    %374 = arith.mulf %371, %373 : vector<8x256xf32>
    %375 = arith.addf %367, %374 : vector<8x256xf32>
    %c2_i32_32 = arith.constant 2 : i32
    %376 = tpu.dynamic_rotate %291 by %c2_i32_32 dim 1 : vector<8x256xf32>, i32 -> vector<8x256xf32>
    %377 = vector.extract_strided_slice %292 {offsets = [0, 10], sizes = [8, 1], strides = [1, 1]} : vector<8x25xf32> to vector<8x1xf32>
    %378 = vector.broadcast %377 : vector<8x1xf32> to vector<8x256xf32>
    %379 = arith.mulf %376, %378 : vector<8x256xf32>
    %380 = vector.extract_strided_slice %2 {offsets = [10, 0], sizes = [1, 256], strides = [1, 1]} : vector<25x256xf32> to vector<1x256xf32>
    %381 = vector.broadcast %380 : vector<1x256xf32> to vector<8x256xf32>
    %382 = arith.mulf %379, %381 : vector<8x256xf32>
    %383 = arith.addf %375, %382 : vector<8x256xf32>
    %c1_i32_33 = arith.constant 1 : i32
    %384 = tpu.dynamic_rotate %291 by %c1_i32_33 dim 1 : vector<8x256xf32>, i32 -> vector<8x256xf32>
    %385 = vector.extract_strided_slice %292 {offsets = [0, 11], sizes = [8, 1], strides = [1, 1]} : vector<8x25xf32> to vector<8x1xf32>
    %386 = vector.broadcast %385 : vector<8x1xf32> to vector<8x256xf32>
    %387 = arith.mulf %384, %386 : vector<8x256xf32>
    %388 = vector.extract_strided_slice %2 {offsets = [11, 0], sizes = [1, 256], strides = [1, 1]} : vector<25x256xf32> to vector<1x256xf32>
    %389 = vector.broadcast %388 : vector<1x256xf32> to vector<8x256xf32>
    %390 = arith.mulf %387, %389 : vector<8x256xf32>
    %391 = arith.addf %383, %390 : vector<8x256xf32>
    %392 = vector.extract_strided_slice %292 {offsets = [0, 12], sizes = [8, 1], strides = [1, 1]} : vector<8x25xf32> to vector<8x1xf32>
    %393 = vector.broadcast %392 : vector<8x1xf32> to vector<8x256xf32>
    %394 = arith.mulf %291, %393 : vector<8x256xf32>
    %395 = arith.addf %391, %394 : vector<8x256xf32>
    %c255_i32_34 = arith.constant 255 : i32
    %396 = tpu.dynamic_rotate %291 by %c255_i32_34 dim 1 : vector<8x256xf32>, i32 -> vector<8x256xf32>
    %397 = vector.extract_strided_slice %292 {offsets = [0, 13], sizes = [8, 1], strides = [1, 1]} : vector<8x25xf32> to vector<8x1xf32>
    %398 = vector.broadcast %397 : vector<8x1xf32> to vector<8x256xf32>
    %399 = arith.mulf %396, %398 : vector<8x256xf32>
    %400 = vector.extract_strided_slice %2 {offsets = [13, 0], sizes = [1, 256], strides = [1, 1]} : vector<25x256xf32> to vector<1x256xf32>
    %401 = vector.broadcast %400 : vector<1x256xf32> to vector<8x256xf32>
    %402 = arith.mulf %399, %401 : vector<8x256xf32>
    %403 = arith.addf %395, %402 : vector<8x256xf32>
    %c254_i32_35 = arith.constant 254 : i32
    %404 = tpu.dynamic_rotate %291 by %c254_i32_35 dim 1 : vector<8x256xf32>, i32 -> vector<8x256xf32>
    %405 = vector.extract_strided_slice %292 {offsets = [0, 14], sizes = [8, 1], strides = [1, 1]} : vector<8x25xf32> to vector<8x1xf32>
    %406 = vector.broadcast %405 : vector<8x1xf32> to vector<8x256xf32>
    %407 = arith.mulf %404, %406 : vector<8x256xf32>
    %408 = vector.extract_strided_slice %2 {offsets = [14, 0], sizes = [1, 256], strides = [1, 1]} : vector<25x256xf32> to vector<1x256xf32>
    %409 = vector.broadcast %408 : vector<1x256xf32> to vector<8x256xf32>
    %410 = arith.mulf %407, %409 : vector<8x256xf32>
    %411 = arith.addf %403, %410 : vector<8x256xf32>
    %c242_i32_36 = arith.constant 242 : i32
    %412 = tpu.dynamic_rotate %291 by %c242_i32_36 dim 1 : vector<8x256xf32>, i32 -> vector<8x256xf32>
    %413 = vector.extract_strided_slice %292 {offsets = [0, 15], sizes = [8, 1], strides = [1, 1]} : vector<8x25xf32> to vector<8x1xf32>
    %414 = vector.broadcast %413 : vector<8x1xf32> to vector<8x256xf32>
    %415 = arith.mulf %412, %414 : vector<8x256xf32>
    %416 = vector.extract_strided_slice %2 {offsets = [15, 0], sizes = [1, 256], strides = [1, 1]} : vector<25x256xf32> to vector<1x256xf32>
    %417 = vector.broadcast %416 : vector<1x256xf32> to vector<8x256xf32>
    %418 = arith.mulf %415, %417 : vector<8x256xf32>
    %419 = arith.addf %411, %418 : vector<8x256xf32>
    %c241_i32_37 = arith.constant 241 : i32
    %420 = tpu.dynamic_rotate %291 by %c241_i32_37 dim 1 : vector<8x256xf32>, i32 -> vector<8x256xf32>
    %421 = vector.extract_strided_slice %292 {offsets = [0, 16], sizes = [8, 1], strides = [1, 1]} : vector<8x25xf32> to vector<8x1xf32>
    %422 = vector.broadcast %421 : vector<8x1xf32> to vector<8x256xf32>
    %423 = arith.mulf %420, %422 : vector<8x256xf32>
    %424 = vector.extract_strided_slice %2 {offsets = [16, 0], sizes = [1, 256], strides = [1, 1]} : vector<25x256xf32> to vector<1x256xf32>
    %425 = vector.broadcast %424 : vector<1x256xf32> to vector<8x256xf32>
    %426 = arith.mulf %423, %425 : vector<8x256xf32>
    %427 = arith.addf %419, %426 : vector<8x256xf32>
    %c240_i32_38 = arith.constant 240 : i32
    %428 = tpu.dynamic_rotate %291 by %c240_i32_38 dim 1 : vector<8x256xf32>, i32 -> vector<8x256xf32>
    %429 = vector.extract_strided_slice %292 {offsets = [0, 17], sizes = [8, 1], strides = [1, 1]} : vector<8x25xf32> to vector<8x1xf32>
    %430 = vector.broadcast %429 : vector<8x1xf32> to vector<8x256xf32>
    %431 = arith.mulf %428, %430 : vector<8x256xf32>
    %432 = vector.extract_strided_slice %2 {offsets = [17, 0], sizes = [1, 256], strides = [1, 1]} : vector<25x256xf32> to vector<1x256xf32>
    %433 = vector.broadcast %432 : vector<1x256xf32> to vector<8x256xf32>
    %434 = arith.mulf %431, %433 : vector<8x256xf32>
    %435 = arith.addf %427, %434 : vector<8x256xf32>
    %c239_i32_39 = arith.constant 239 : i32
    %436 = tpu.dynamic_rotate %291 by %c239_i32_39 dim 1 : vector<8x256xf32>, i32 -> vector<8x256xf32>
    %437 = vector.extract_strided_slice %292 {offsets = [0, 18], sizes = [8, 1], strides = [1, 1]} : vector<8x25xf32> to vector<8x1xf32>
    %438 = vector.broadcast %437 : vector<8x1xf32> to vector<8x256xf32>
    %439 = arith.mulf %436, %438 : vector<8x256xf32>
    %440 = vector.extract_strided_slice %2 {offsets = [18, 0], sizes = [1, 256], strides = [1, 1]} : vector<25x256xf32> to vector<1x256xf32>
    %441 = vector.broadcast %440 : vector<1x256xf32> to vector<8x256xf32>
    %442 = arith.mulf %439, %441 : vector<8x256xf32>
    %443 = arith.addf %435, %442 : vector<8x256xf32>
    %c238_i32_40 = arith.constant 238 : i32
    %444 = tpu.dynamic_rotate %291 by %c238_i32_40 dim 1 : vector<8x256xf32>, i32 -> vector<8x256xf32>
    %445 = vector.extract_strided_slice %292 {offsets = [0, 19], sizes = [8, 1], strides = [1, 1]} : vector<8x25xf32> to vector<8x1xf32>
    %446 = vector.broadcast %445 : vector<8x1xf32> to vector<8x256xf32>
    %447 = arith.mulf %444, %446 : vector<8x256xf32>
    %448 = vector.extract_strided_slice %2 {offsets = [19, 0], sizes = [1, 256], strides = [1, 1]} : vector<25x256xf32> to vector<1x256xf32>
    %449 = vector.broadcast %448 : vector<1x256xf32> to vector<8x256xf32>
    %450 = arith.mulf %447, %449 : vector<8x256xf32>
    %451 = arith.addf %443, %450 : vector<8x256xf32>
    %c226_i32_41 = arith.constant 226 : i32
    %452 = tpu.dynamic_rotate %291 by %c226_i32_41 dim 1 : vector<8x256xf32>, i32 -> vector<8x256xf32>
    %453 = vector.extract_strided_slice %292 {offsets = [0, 20], sizes = [8, 1], strides = [1, 1]} : vector<8x25xf32> to vector<8x1xf32>
    %454 = vector.broadcast %453 : vector<8x1xf32> to vector<8x256xf32>
    %455 = arith.mulf %452, %454 : vector<8x256xf32>
    %456 = vector.extract_strided_slice %2 {offsets = [20, 0], sizes = [1, 256], strides = [1, 1]} : vector<25x256xf32> to vector<1x256xf32>
    %457 = vector.broadcast %456 : vector<1x256xf32> to vector<8x256xf32>
    %458 = arith.mulf %455, %457 : vector<8x256xf32>
    %459 = arith.addf %451, %458 : vector<8x256xf32>
    %c225_i32_42 = arith.constant 225 : i32
    %460 = tpu.dynamic_rotate %291 by %c225_i32_42 dim 1 : vector<8x256xf32>, i32 -> vector<8x256xf32>
    %461 = vector.extract_strided_slice %292 {offsets = [0, 21], sizes = [8, 1], strides = [1, 1]} : vector<8x25xf32> to vector<8x1xf32>
    %462 = vector.broadcast %461 : vector<8x1xf32> to vector<8x256xf32>
    %463 = arith.mulf %460, %462 : vector<8x256xf32>
    %464 = vector.extract_strided_slice %2 {offsets = [21, 0], sizes = [1, 256], strides = [1, 1]} : vector<25x256xf32> to vector<1x256xf32>
    %465 = vector.broadcast %464 : vector<1x256xf32> to vector<8x256xf32>
    %466 = arith.mulf %463, %465 : vector<8x256xf32>
    %467 = arith.addf %459, %466 : vector<8x256xf32>
    %c224_i32_43 = arith.constant 224 : i32
    %468 = tpu.dynamic_rotate %291 by %c224_i32_43 dim 1 : vector<8x256xf32>, i32 -> vector<8x256xf32>
    %469 = vector.extract_strided_slice %292 {offsets = [0, 22], sizes = [8, 1], strides = [1, 1]} : vector<8x25xf32> to vector<8x1xf32>
    %470 = vector.broadcast %469 : vector<8x1xf32> to vector<8x256xf32>
    %471 = arith.mulf %468, %470 : vector<8x256xf32>
    %472 = vector.extract_strided_slice %2 {offsets = [22, 0], sizes = [1, 256], strides = [1, 1]} : vector<25x256xf32> to vector<1x256xf32>
    %473 = vector.broadcast %472 : vector<1x256xf32> to vector<8x256xf32>
    %474 = arith.mulf %471, %473 : vector<8x256xf32>
    %475 = arith.addf %467, %474 : vector<8x256xf32>
    %c223_i32_44 = arith.constant 223 : i32
    %476 = tpu.dynamic_rotate %291 by %c223_i32_44 dim 1 : vector<8x256xf32>, i32 -> vector<8x256xf32>
    %477 = vector.extract_strided_slice %292 {offsets = [0, 23], sizes = [8, 1], strides = [1, 1]} : vector<8x25xf32> to vector<8x1xf32>
    %478 = vector.broadcast %477 : vector<8x1xf32> to vector<8x256xf32>
    %479 = arith.mulf %476, %478 : vector<8x256xf32>
    %480 = vector.extract_strided_slice %2 {offsets = [23, 0], sizes = [1, 256], strides = [1, 1]} : vector<25x256xf32> to vector<1x256xf32>
    %481 = vector.broadcast %480 : vector<1x256xf32> to vector<8x256xf32>
    %482 = arith.mulf %479, %481 : vector<8x256xf32>
    %483 = arith.addf %475, %482 : vector<8x256xf32>
    %c222_i32_45 = arith.constant 222 : i32
    %484 = tpu.dynamic_rotate %291 by %c222_i32_45 dim 1 : vector<8x256xf32>, i32 -> vector<8x256xf32>
    %485 = vector.extract_strided_slice %292 {offsets = [0, 24], sizes = [8, 1], strides = [1, 1]} : vector<8x25xf32> to vector<8x1xf32>
    %486 = vector.broadcast %485 : vector<8x1xf32> to vector<8x256xf32>
    %487 = arith.mulf %484, %486 : vector<8x256xf32>
    %488 = vector.extract_strided_slice %2 {offsets = [24, 0], sizes = [1, 256], strides = [1, 1]} : vector<25x256xf32> to vector<1x256xf32>
    %489 = vector.broadcast %488 : vector<1x256xf32> to vector<8x256xf32>
    %490 = arith.mulf %487, %489 : vector<8x256xf32>
    %491 = arith.addf %483, %490 : vector<8x256xf32>
    %cst_46 = arith.constant 1.000000e-01 : f32
    %492 = vector.broadcast %cst_46 : f32 to vector<8x256xf32>
    %493 = arith.mulf %492, %491 : vector<8x256xf32>
    %494 = arith.maximumf %491, %493 : vector<8x256xf32>
    %c0_47 = arith.constant 0 : index
    %c0_48 = arith.constant 0 : index
    %495 = vector.load %arg11[%c0_47, %c0_48] : memref<8x8xf32, #tpu.memory_space<vmem>>, vector<8x8xf32>
    %c0_49 = arith.constant 0 : index
    %c0_50 = arith.constant 0 : index
    %496 = vector.load %arg12[%c0_49, %c0_50] : memref<8x1xf32, #tpu.memory_space<vmem>>, vector<8x1xf32>
    %497 = vector.shape_cast %496 : vector<8x1xf32> to vector<8x1xf32>
    %498 = vector.broadcast %497 : vector<8x1xf32> to vector<8x256xf32>
    %499 = vector.extract_strided_slice %495 {offsets = [0, 0], sizes = [8, 1], strides = [1, 1]} : vector<8x8xf32> to vector<8x1xf32>
    %500 = vector.extract_strided_slice %494 {offsets = [0, 0], sizes = [1, 256], strides = [1, 1]} : vector<8x256xf32> to vector<1x256xf32>
    %501 = vector.broadcast %499 : vector<8x1xf32> to vector<8x256xf32>
    %502 = vector.broadcast %500 : vector<1x256xf32> to vector<8x256xf32>
    %503 = arith.mulf %501, %502 : vector<8x256xf32>
    %504 = arith.addf %498, %503 : vector<8x256xf32>
    %505 = vector.extract_strided_slice %495 {offsets = [0, 1], sizes = [8, 1], strides = [1, 1]} : vector<8x8xf32> to vector<8x1xf32>
    %506 = vector.extract_strided_slice %494 {offsets = [1, 0], sizes = [1, 256], strides = [1, 1]} : vector<8x256xf32> to vector<1x256xf32>
    %507 = vector.broadcast %505 : vector<8x1xf32> to vector<8x256xf32>
    %508 = vector.broadcast %506 : vector<1x256xf32> to vector<8x256xf32>
    %509 = arith.mulf %507, %508 : vector<8x256xf32>
    %510 = arith.addf %504, %509 : vector<8x256xf32>
    %511 = vector.extract_strided_slice %495 {offsets = [0, 2], sizes = [8, 1], strides = [1, 1]} : vector<8x8xf32> to vector<8x1xf32>
    %512 = vector.extract_strided_slice %494 {offsets = [2, 0], sizes = [1, 256], strides = [1, 1]} : vector<8x256xf32> to vector<1x256xf32>
    %513 = vector.broadcast %511 : vector<8x1xf32> to vector<8x256xf32>
    %514 = vector.broadcast %512 : vector<1x256xf32> to vector<8x256xf32>
    %515 = arith.mulf %513, %514 : vector<8x256xf32>
    %516 = arith.addf %510, %515 : vector<8x256xf32>
    %517 = vector.extract_strided_slice %495 {offsets = [0, 3], sizes = [8, 1], strides = [1, 1]} : vector<8x8xf32> to vector<8x1xf32>
    %518 = vector.extract_strided_slice %494 {offsets = [3, 0], sizes = [1, 256], strides = [1, 1]} : vector<8x256xf32> to vector<1x256xf32>
    %519 = vector.broadcast %517 : vector<8x1xf32> to vector<8x256xf32>
    %520 = vector.broadcast %518 : vector<1x256xf32> to vector<8x256xf32>
    %521 = arith.mulf %519, %520 : vector<8x256xf32>
    %522 = arith.addf %516, %521 : vector<8x256xf32>
    %523 = vector.extract_strided_slice %495 {offsets = [0, 4], sizes = [8, 1], strides = [1, 1]} : vector<8x8xf32> to vector<8x1xf32>
    %524 = vector.extract_strided_slice %494 {offsets = [4, 0], sizes = [1, 256], strides = [1, 1]} : vector<8x256xf32> to vector<1x256xf32>
    %525 = vector.broadcast %523 : vector<8x1xf32> to vector<8x256xf32>
    %526 = vector.broadcast %524 : vector<1x256xf32> to vector<8x256xf32>
    %527 = arith.mulf %525, %526 : vector<8x256xf32>
    %528 = arith.addf %522, %527 : vector<8x256xf32>
    %529 = vector.extract_strided_slice %495 {offsets = [0, 5], sizes = [8, 1], strides = [1, 1]} : vector<8x8xf32> to vector<8x1xf32>
    %530 = vector.extract_strided_slice %494 {offsets = [5, 0], sizes = [1, 256], strides = [1, 1]} : vector<8x256xf32> to vector<1x256xf32>
    %531 = vector.broadcast %529 : vector<8x1xf32> to vector<8x256xf32>
    %532 = vector.broadcast %530 : vector<1x256xf32> to vector<8x256xf32>
    %533 = arith.mulf %531, %532 : vector<8x256xf32>
    %534 = arith.addf %528, %533 : vector<8x256xf32>
    %535 = vector.extract_strided_slice %495 {offsets = [0, 6], sizes = [8, 1], strides = [1, 1]} : vector<8x8xf32> to vector<8x1xf32>
    %536 = vector.extract_strided_slice %494 {offsets = [6, 0], sizes = [1, 256], strides = [1, 1]} : vector<8x256xf32> to vector<1x256xf32>
    %537 = vector.broadcast %535 : vector<8x1xf32> to vector<8x256xf32>
    %538 = vector.broadcast %536 : vector<1x256xf32> to vector<8x256xf32>
    %539 = arith.mulf %537, %538 : vector<8x256xf32>
    %540 = arith.addf %534, %539 : vector<8x256xf32>
    %541 = vector.extract_strided_slice %495 {offsets = [0, 7], sizes = [8, 1], strides = [1, 1]} : vector<8x8xf32> to vector<8x1xf32>
    %542 = vector.extract_strided_slice %494 {offsets = [7, 0], sizes = [1, 256], strides = [1, 1]} : vector<8x256xf32> to vector<1x256xf32>
    %543 = vector.broadcast %541 : vector<8x1xf32> to vector<8x256xf32>
    %544 = vector.broadcast %542 : vector<1x256xf32> to vector<8x256xf32>
    %545 = arith.mulf %543, %544 : vector<8x256xf32>
    %546 = arith.addf %540, %545 : vector<8x256xf32>
    %cst_51 = arith.constant 1.000000e-01 : f32
    %547 = vector.broadcast %cst_51 : f32 to vector<8x256xf32>
    %548 = arith.mulf %547, %546 : vector<8x256xf32>
    %549 = arith.maximumf %546, %548 : vector<8x256xf32>
    %c0_52 = arith.constant 0 : index
    %c0_53 = arith.constant 0 : index
    %c0_54 = arith.constant 0 : index
    %550 = vector.load %arg13[%c0_52, %c0_53, %c0_54] : memref<1x8x256xf32, #tpu.memory_space<vmem>>, vector<1x8x256xf32>
    %551 = vector.shape_cast %550 : vector<1x8x256xf32> to vector<8x256xf32>
    %552 = vector.shape_cast %494 : vector<8x256xf32> to vector<1x8x256xf32>
    tpu.vector_store %arg13[%c0_52, %c0_53, %c0_54], %552 {strides = array<i32>} : memref<1x8x256xf32, #tpu.memory_space<vmem>>, vector<1x8x256xf32>,
    %c0_55 = arith.constant 0 : index
    %c0_56 = arith.constant 0 : index
    %c0_57 = arith.constant 0 : index
    %553 = vector.load %arg14[%c0_55, %c0_56, %c0_57] : memref<1x8x256xf32, #tpu.memory_space<vmem>>, vector<1x8x256xf32>
    %554 = vector.shape_cast %553 : vector<1x8x256xf32> to vector<8x256xf32>
    %555 = vector.shape_cast %549 : vector<8x256xf32> to vector<1x8x256xf32>
    tpu.vector_store %arg14[%c0_55, %c0_56, %c0_57], %555 {strides = array<i32>} : memref<1x8x256xf32, #tpu.memory_space<vmem>>, vector<1x8x256xf32>,
    return
  }
  func.func @transform_0(%arg0: i32) -> (i32, i32, i32) {
    %c0_i32 = arith.constant 0 : i32
    %c0_i32_0 = arith.constant 0 : i32
    %c0_i32_1 = arith.constant 0 : i32
    return %arg0, %c0_i32, %c0_i32_0 : i32, i32, i32
  }
  func.func @transform_1(%arg0: i32) -> (i32, i32) {
    %c0_i32 = arith.constant 0 : i32
    %c0_i32_0 = arith.constant 0 : i32
    %c0_i32_1 = arith.constant 0 : i32
    return %c0_i32, %c0_i32_0 : i32, i32
  }
  func.func @transform_2(%arg0: i32) -> (i32, i32) {
    %c0_i32 = arith.constant 0 : i32
    %c0_i32_0 = arith.constant 0 : i32
    %c0_i32_1 = arith.constant 0 : i32
    return %c0_i32, %c0_i32_0 : i32, i32
  }
  func.func @transform_3(%arg0: i32) -> (i32, i32) {
    %c0_i32 = arith.constant 0 : i32
    %c0_i32_0 = arith.constant 0 : i32
    %c0_i32_1 = arith.constant 0 : i32
    return %c0_i32, %c0_i32_0 : i32, i32
  }
  func.func @transform_4(%arg0: i32) -> (i32, i32) {
    %c0_i32 = arith.constant 0 : i32
    %c0_i32_0 = arith.constant 0 : i32
    %c0_i32_1 = arith.constant 0 : i32
    return %c0_i32, %c0_i32_0 : i32, i32
  }
  func.func @transform_5(%arg0: i32) -> (i32, i32) {
    %c0_i32 = arith.constant 0 : i32
    %c0_i32_0 = arith.constant 0 : i32
    %c0_i32_1 = arith.constant 0 : i32
    return %c0_i32, %c0_i32_0 : i32, i32
  }
  func.func @transform_6(%arg0: i32) -> (i32, i32) {
    %c0_i32 = arith.constant 0 : i32
    %c0_i32_0 = arith.constant 0 : i32
    %c0_i32_1 = arith.constant 0 : i32
    return %c0_i32, %c0_i32_0 : i32, i32
  }
  func.func @transform_7(%arg0: i32) -> (i32, i32) {
    %c0_i32 = arith.constant 0 : i32
    %c0_i32_0 = arith.constant 0 : i32
    %c0_i32_1 = arith.constant 0 : i32
    return %c0_i32, %c0_i32_0 : i32, i32
  }
  func.func @transform_8(%arg0: i32) -> (i32, i32) {
    %c0_i32 = arith.constant 0 : i32
    %c0_i32_0 = arith.constant 0 : i32
    %c0_i32_1 = arith.constant 0 : i32
    return %c0_i32, %c0_i32_0 : i32, i32
  }
  func.func @transform_9(%arg0: i32) -> (i32, i32) {
    %c0_i32 = arith.constant 0 : i32
    %c0_i32_0 = arith.constant 0 : i32
    %c0_i32_1 = arith.constant 0 : i32
    return %c0_i32, %c0_i32_0 : i32, i32
  }
  func.func @transform_10(%arg0: i32) -> (i32, i32) {
    %c0_i32 = arith.constant 0 : i32
    %c0_i32_0 = arith.constant 0 : i32
    %c0_i32_1 = arith.constant 0 : i32
    return %c0_i32, %c0_i32_0 : i32, i32
  }
  func.func @transform_11(%arg0: i32) -> (i32, i32) {
    %c0_i32 = arith.constant 0 : i32
    %c0_i32_0 = arith.constant 0 : i32
    %c0_i32_1 = arith.constant 0 : i32
    return %c0_i32, %c0_i32_0 : i32, i32
  }
  func.func @transform_12(%arg0: i32) -> (i32, i32, i32) {
    %c0_i32 = arith.constant 0 : i32
    %c0_i32_0 = arith.constant 0 : i32
    %c0_i32_1 = arith.constant 0 : i32
    return %arg0, %c0_i32, %c0_i32_0 : i32, i32, i32
  }
  func.func @transform_13(%arg0: i32) -> (i32, i32, i32) {
    %c0_i32 = arith.constant 0 : i32
    %c0_i32_0 = arith.constant 0 : i32
    %c0_i32_1 = arith.constant 0 : i32
    return %arg0, %c0_i32, %c0_i32_0 : i32, i32, i32
  }
}

</mosaic_0001>

<bundles_post_ra>
// kernel: ppyolo_tiny_det_block.1
= control target key start
LH: loop header
LB: loop body
LE: loop exit
PB: predicated region body
PF: predicated region fallthrough
CT: control target
= control target key end

     0   :  { %s2248_s25 = smov 0   ;;  %s3598_s0 = inlined_call_operand.vmem [shape: f32[2,4,256], index: 0, kind: input, shape index: {}]   ;;  %s3599_s1 = inlined_call_operand.vmem [shape: f32[25,256], index: 1, kind: input, shape index: {}]   ;;  %s3600_s2 = inlined_call_operand.vmem [shape: f32[8,4], index: 2, kind: input, shape index: {}]   ;;  %s3601_s3 = inlined_call_operand.vmem [shape: f32[8,1], index: 3, kind: input, shape index: {}]   ;;  %s3602_s4 = inlined_call_operand.vmem [shape: f32[8,25], index: 4, kind: input, shape index: {}]   ;;  %s3603_s5 = inlined_call_operand.vmem [shape: f32[8,1], index: 5, kind: input, shape index: {}]   ;;  %s3604_s6 = inlined_call_operand.vmem [shape: f32[8,8], index: 6, kind: input, shape index: {}]   ;;  %s3605_s7 = inlined_call_operand.vmem [shape: f32[8,1], index: 7, kind: input, shape index: {}]   ;;  %s3606_s8 = inlined_call_operand.vmem [shape: f32[8,25], index: 8, kind: input, shape index: {}]   ;;  %s3607_s9 = inlined_call_operand.vmem [shape: f32[8,1], index: 9, kind: input, shape index: {}]   ;;  %s3608_s10 = inlined_call_operand.vmem [shape: f32[8,8], index: 10, kind: input, shape index: {}]   ;;  %s3609_s11 = inlined_call_operand.vmem [shape: f32[8,1], index: 11, kind: input, shape index: {}]   ;;  %s3610_s12 = inlined_call_operand.vmem [shape: f32[2,8,256], index: 12, kind: output, shape index: {0}]   ;;  %s3611_s13 = inlined_call_operand.vmem [shape: f32[2,8,256], index: 13, kind: output, shape index: {1}]  }
   0x1 LB: > { %s1978_s26 = sadd.s32 4294967295, %s2127_s25   ;;  %p1982_p0 = scmp.ge.s32.totalorder %s2127_s25, 1  ;;  %s2127_s25 = sphi %s2248_s25, %s24_s25  }
   0x2   : > { %p390_p1 = scmp.lt.s32.totalorder %s2127_s25, 3 }
   0x4   : > { %p391_p2 = pnand %p1982_p0, %p390_p1 }
   0x6   : > { %394 = sbr.rel (%p391_p2) target bundleno = 833 (0x341), region = 68 }
   0xd   : > { %v464_v0 = vld [vmem:[%s3601_s3] sm:$0xff]  ;;  %v3649_v2 = vmov 0   ;;  %v3629_v3 = vmov 1   ;;  %v3654_v4 = vmov 2   ;;  %v3658_v7 = vmov 3   ;;  %p439_p3 = scmp.lt.s32.totalorder %s1978_s26, 1 }
   0xe   : > { %v463_v1 = vld [vmem:[%s3600_s2] sm:$0xff]  ;;  %2053 = vset.pattern.permute.xlu0 %v3649_v2  ;;  %2054 = vset.pattern.permute.xlu1 %v3629_v3  ;;  %v3648_v8 = vmov 12   ;;  %v3626_v9 = vmov 4   ;;  %v3647_v10 = vmov 13   ;;  %v3659_v11 = vmov 5   ;;  %s2148_s22 = smov 34  }
   0xf   : > { %467 = vperm.xlu0 %2053, %v464_v0   ;;  %499 = vperm.xlu1 %2054, %v463_v1   ;;  %v2268_v5 = vld [vmem:[%s3602_s4] sm:$0xff]  ;;  %v3651_v12 = vmov 6   ;;  %v3630_v13 = vmov 7   ;;  %v2139_v14 = vmov 8   ;;  %v2140_v15 = vmov 9   ;;  %s3871_s26 = smov (!%p439_p3, %s1978_s26), 1 }
  0x10   : > { %v581_v6 = vld [vmem:[%s3603_s5] sm:$0xff]  ;;  %v2141_v16 = vmov 10   ;;  %v2142_v17 = vmov 11   ;;  %v2143_v18 = vmov 14   ;;  %v3646_v19 = vmov 15   ;;  %s1993_s18 = sshll.u32 %s3871_s26, 3 }
  0x11   : > { %v3645_v20 = vmov 16   ;;  %v2146_v21 = vmov 17   ;;  %v3644_v22 = vmov 18   ;;  %v3653_v23 = vlaneseq  ;;  %s443_s21 = scalar_lea.vmem %s3598_s0, %s1993_s18  ;;  %s2149_s23 = smov 33  }
  0x12   : > { %v454_v27 = vld [vmem:[%s443_s21] sm:$0xff]  ;;  %s2150_s24 = smov 127   ;;  %s2151_s27 = smov 32  }
  0x13   : > { %472 = vperm.xlu0 %2053, %v463_v1   ;;  %2055 = vset.pattern.permute.xlu1 %v3654_v4  ;;  %v477_v24 = vshrl.u32 %v3653_v23, 7  ;;  %s2152_s28 = smov 126   ;;  %s2153_s29 = smov 31  }
  0x14   : > { %525 = vperm.xlu1 %2055, %v463_v1   ;;  %s2155_s30 = smov 30   ;;  %s2158_s14 = smov 18  }
  0x15   : > { %v2320_v25 = vsub.s32 0, %v477_v24  ;;  %v2322_v26 = vsub.s32 4, %v477_v24  ;;  %v2324_v28 = vsub.s32 1, %v477_v24  ;;  %v2326_v29 = vsub.s32 5, %v477_v24  ;;  %s2161_s15 = smov 17   ;;  %s3668_s16 = smov 16  }
  0x16   : > { %v2330_v32 = vsub.s32 2, %v477_v24  ;;  %v2332_v33 = vsub.s32 6, %v477_v24  ;;  %v2340_v42 = vsub.s32 3, %v477_v24  ;;  %v2342_v43 = vsub.s32 7, %v477_v24  ;;  %s3664_s19 = smov 15   ;;  %s3640_s17 = smov 14  }
  0x17   : > { %2057 = vset.pattern.permute.xlu0 %v3654_v4  ;;  %3726 = vst [vmem:[#allocation2_spill] sm:$0xff] %v2320_v25  ;;  %3727 = vst [vmem:[#allocation3_spill] sm:$0xff] %v2324_v28  ;;  %v479_v30 = vrot.slane %v454_v27, %v2320_v25  ;;  %v483_v31 = vrot.slane %v454_v27, %v2322_v26  ;;  %v505_v34 = vrot.slane %v454_v27, %v2324_v28  ;;  %s3622_s18 = smov 2   ;;  %s3612_s20 = smov 1  }
  0x18   : > { %648 = vperm.xlu0 %2057, %v2268_v5   ;;  %2056 = vset.pattern.permute.xlu1 %v3649_v2  ;;  %3728 = vst [vmem:[#allocation4_spill] sm:$0xff] %v2326_v29  ;;  %3729 = vst [vmem:[#allocation5_spill] sm:$0xff] %v2330_v32  ;;  %v509_v35 = vrot.slane %v454_v27, %v2326_v29  ;;  %v531_v40 = vrot.slane %v454_v27, %v2330_v32  ;;  %s3614_s21 = smov 114  }
  0x19   : > { %584 = vperm.xlu1 %2056, %v581_v6   ;;  %3730 = vst [vmem:[#allocation6_spill] sm:$0xff] %v2332_v33  ;;  %v489_v37 = vrot.slane %v479_v30, %v2320_v25  ;;  %v493_v38 = vrot.slane %v483_v31, %v2320_v25  ;;  %v535_v41 = vrot.slane %v454_v27, %v2332_v33  ;;  %3731 = vst [vmem:[#allocation7_spill] sm:$0xff] %v2340_v42 }
  0x1a   : > { %3732 = vst [vmem:[#allocation8_spill] sm:$0xff] %v2342_v43  ;;  %v515_v44 = vrot.slane %v505_v34, %v2324_v28  ;;  %v519_v45 = vrot.slane %v509_v35, %v2324_v28  ;;  %v541_v49 = vrot.slane %v531_v40, %v2330_v32  ;;  %v557_v51 = vrot.slane %v454_v27, %v2340_v42 }
  0x1b   : > { %v545_v50 = vrot.slane %v535_v41, %v2330_v32  ;;  %v561_v52 = vrot.slane %v454_v27, %v2342_v43  ;;  %v3642_v40 = vmov 20   ;;  %v3637_v41 = vmov 21  }
  0x1c   : > { %2058 = vset.pattern.permute.xlu0 %v3658_v7  ;;  %v567_v59 = vrot.slane %v557_v51, %v2340_v42 }
  0x1d   : > { %551 = vperm.xlu0 %2058, %v463_v1   ;;  %598 = vperm.xlu1 %2056, %v2268_v5   ;;  %v571_v60 = vrot.slane %v561_v52, %v2340_v42 }
  0x21   : > { %673 = vperm.xlu0 %2058, %v2268_v5   ;;  %2067 = vset.pattern.permute.xlu1 %v3648_v8 }
  0x22   : > { %891 = vperm.xlu1 %2067, %v2268_v5  }
  0x25   : > { %2059 = vset.pattern.permute.xlu0 %v3626_v9 }
  0x26   : > { %698 = vperm.xlu0 %2059, %v2268_v5   ;;  %2068 = vset.pattern.permute.xlu1 %v3647_v10 }
  0x27   : > { %906 = vperm.xlu1 %2068, %v2268_v5  }
  0x2a   : > { %2060 = vset.pattern.permute.xlu0 %v3659_v11 }
  0x2b   : > { %723 = vperm.xlu0 %2060, %v2268_v5   ;;  %2081 = vset.pattern.permute.xlu1 %v3649_v2 }
  0x2f   : > { %2061 = vset.pattern.permute.xlu0 %v3651_v12 }
  0x30   : > { %748 = vperm.xlu0 %2061, %v2268_v5  }
  0x34   : > { %2062 = vset.pattern.permute.xlu0 %v3630_v13 }
  0x35   : > { %773 = vperm.xlu0 %2062, %v2268_v5  }
  0x39   : > { %2063 = vset.pattern.permute.xlu0 %v2139_v14 }
  0x3a   : > { %798 = vperm.xlu0 %2063, %v2268_v5  }
  0x3e   : > { %2064 = vset.pattern.permute.xlu0 %v2140_v15 }
  0x3f   : > { %823 = vperm.xlu0 %2064, %v2268_v5  }
  0x43   : > { %2065 = vset.pattern.permute.xlu0 %v2141_v16 }
  0x44   : > { %848 = vperm.xlu0 %2065, %v2268_v5  }
  0x48   : > { %2066 = vset.pattern.permute.xlu0 %v2142_v17 }
  0x49   : > { %873 = vperm.xlu0 %2066, %v2268_v5  }
  0x4d   : > { %2069 = vset.pattern.permute.xlu0 %v2143_v18 }
  0x4e   : > { %931 = vperm.xlu0 %2069, %v2268_v5  }
  0x52   : > { %2070 = vset.pattern.permute.xlu0 %v3646_v19 }
  0x53   : > { %956 = vperm.xlu0 %2070, %v2268_v5  }
  0x57   : > { %2071 = vset.pattern.permute.xlu0 %v3645_v20 }
  0x58   : > { %981 = vperm.xlu0 %2071, %v2268_v5  }
  0x5c   : > { %2072 = vset.pattern.permute.xlu0 %v2146_v21 }
  0x5d   : > { %1006 = vperm.xlu0 %2072, %v2268_v5  }
  0x61   : > { %2073 = vset.pattern.permute.xlu0 %v3644_v22 }
  0x8e   : > { %v468_v36 = vpop.permute.xlu0 %467  ;;  %v500_v39 = vpop.permute.xlu1 %499 }
  0x8f   : > { %v520_v53 = vmul.f32 %v515_v44, %v500_v39  ;;  %v521_v54 = vmul.f32 %v519_v45, %v500_v39  ;;  %v3643_v39 = vmov 19   ;;  %v3636_v44 = vmov 22  }
  0x90   : > { %v3633_v45 = vmov 23  }
  0x92   : > { %v473_v46 = vpop.permute.xlu0 %472 }
  0x93   : > { %v494_v47 = vmul.f32 %v489_v37, %v473_v46  ;;  %v495_v48 = vmul.f32 %v493_v38, %v473_v46  ;;  %v526_v57 = vpop.permute.xlu1 %525  ;;  %v3632_v46 = vmov 24  }
  0x94   : > { %v546_v63 = vmul.f32 %v541_v49, %v526_v57  ;;  %v547_v0 = vmul.f32 %v545_v50, %v526_v57 }
  0x95   : > { %v496_v55 = vadd.f32 %v494_v47, %v468_v36  ;;  %v497_v56 = vadd.f32 %v495_v48, %v468_v36  ;;  %v2412_v47 = vld [vmem:[%s3604_s6] sm:$0xff] }
  0x96   : > { %v2420_v48 = vld [vmem:[%s3606_s8] sm:$0xff] }
  0x97   : > { %v2350_v58 = vpop.permute.xlu0 %648  ;;  %v522_v61 = vadd.f32 %v520_v53, %v496_v55  ;;  %v523_v62 = vadd.f32 %v521_v54, %v497_v56 }
  0x98   : > { %v2460_v53 = vpop.permute.xlu1 %584 }
  0x99   : > { %v548_v6 = vadd.f32 %v546_v63, %v522_v61  ;;  %v549_v24 = vadd.f32 %v547_v0, %v523_v62 }
  0x9c   : > { %v552_v1 = vpop.permute.xlu0 %551  ;;  %v2471_v55 = vpop.permute.xlu1 %598 }
  0x9d   : > { %v572_v30 = vmul.f32 %v567_v59, %v552_v1  ;;  %v573_v27 = vmul.f32 %v571_v60, %v552_v1 }
  0x9f   : > { %v574_v31 = vadd.f32 %v572_v30, %v548_v6  ;;  %v575_v34 = vadd.f32 %v573_v27, %v549_v24 }
  0xa1   : > { %v576_v35 = vmul.f32 0.1, %v574_v31  ;;  %v577_v36 = vmul.f32 0.1, %v575_v34  ;;  %v2479_v57 = vpop.permute.xlu1 %891 }
  0xa3   : > { %v2354_v37 = vmax.f32 %v574_v31, %v576_v35  ;;  %v2356_v38 = vmax.f32 %v575_v34, %v577_v36 }
  0xa5   : > { %3733 = vst [vmem:[#allocation9_spill] sm:$0xff] %v2356_v38  ;;  %589 = vrot.lane.b32.xlu0 %v2356_v38, %s2148_s22  ;;  %587 = vrot.lane.b32.xlu1 %v2354_v37, %s2148_s22 }
  0xa6   : > { %v2489_v60 = vpop.permute.xlu1 %906 }
  0xa7   : > { %3734 = vst [vmem:[#allocation10_spill] sm:$0xff] %v2489_v60 }
  0xa9   : > { %615 = vrot.lane.b32.xlu0 %v2354_v37, %s2149_s23  ;;  %617 = vrot.lane.b32.xlu1 %v2356_v38, %s2149_s23 }
  0xad   : > { %900 = vrot.lane.b32.xlu0 %v2356_v38, %s2150_s24  ;;  %640 = vrot.lane.b32.xlu1 %v2354_v37, %s2151_s27 }
  0xb1   : > { %923 = vrot.lane.b32.xlu0 %v2354_v37, %s2152_s28  ;;  %642 = vrot.lane.b32.xlu1 %v2356_v38, %s2151_s27 }
  0xb5   : > { %1031 = vperm.xlu0 %2073, %v2268_v5   ;;  %665 = vrot.lane.b32.xlu1 %v2354_v37, %s2153_s29 }
  0xb9   : > { %2074 = vset.pattern.permute.xlu0 %v3643_v39  ;;  %667 = vrot.lane.b32.xlu1 %v2356_v38, %s2153_s29 }
  0xba   : > { %1056 = vperm.xlu0 %2074, %v2268_v5  }
  0xbd   : > { %690 = vrot.lane.b32.xlu1 %v2354_v37, %s2155_s30 }
  0xbe   : > { %2075 = vset.pattern.permute.xlu0 %v3642_v40  ;;  %v1203_v40 = vld [vmem:[%s3605_s7] sm:$0xff] }
  0xbf   : > { %1081 = vperm.xlu0 %2075, %v2268_v5  }
  0xc1   : > { %692 = vrot.lane.b32.xlu1 %v2356_v38, %s2155_s30 }
  0xc3   : > { %2076 = vset.pattern.permute.xlu0 %v3637_v41 }
  0xc4   : > { %1106 = vperm.xlu0 %2076, %v2268_v5  }
  0xc5   : > { %715 = vrot.lane.b32.xlu1 %v2354_v37, %s2158_s14 }
  0xc8   : > { %2077 = vset.pattern.permute.xlu0 %v3636_v44 }
  0xc9   : > { %1131 = vperm.xlu0 %2077, %v2268_v5   ;;  %717 = vrot.lane.b32.xlu1 %v2356_v38, %s2158_s14 }
  0xcd   : > { %2078 = vset.pattern.permute.xlu0 %v3633_v45  ;;  %740 = vrot.lane.b32.xlu1 %v2354_v37, %s2161_s15 }
  0xce   : > { %1156 = vperm.xlu0 %2078, %v2268_v5  }
  0xd1   : > { %742 = vrot.lane.b32.xlu1 %v2356_v38, %s2161_s15 }
  0xd2   : > { %2079 = vset.pattern.permute.xlu0 %v3632_v46 }
  0xd3   : > { %1181 = vperm.xlu0 %2079, %v2268_v5  }
  0xd5   : > { %765 = vrot.lane.b32.xlu1 %v2354_v37, %s3668_s16 }
  0xd7   : > { %2080 = vset.pattern.permute.xlu0 %v3629_v3 }
  0xd8   : > { %623 = vperm.xlu0 %2080, %v2268_v5   ;;  %v2429_v5 = vpop.permute.xlu0 %673 }
  0xd9   : > { %767 = vrot.lane.b32.xlu1 %v2356_v38, %s3668_s16  ;;  %s3819_s16 = smov 110  }
  0xdc   : > { %1227 = vperm.xlu0 %2080, %v2412_v47   ;;  %v2435_v49 = vpop.permute.xlu0 %698 }
  0xdd   : > { %790 = vrot.lane.b32.xlu1 %v2354_v37, %s3664_s19 }
  0xe0   : > { %1373 = vperm.xlu0 %2080, %v2420_v48   ;;  %v2443_v50 = vpop.permute.xlu0 %723 }
  0xe1   : > { %792 = vrot.lane.b32.xlu1 %v2356_v38, %s3664_s19  ;;  %s3806_s19 = smov 14  }
  0xe4   : > { %2087 = vset.pattern.permute.xlu0 %v3654_v4  ;;  %v2449_v51 = vpop.permute.xlu0 %748 }
  0xe5   : > { %815 = vrot.lane.b32.xlu1 %v2354_v37, %s3640_s17  ;;  %1389 = vperm.xlu0 %2087, %v2420_v48  }
  0xe8   : > { %v2458_v52 = vpop.permute.xlu0 %773 }
  0xe9   : > { %817 = vrot.lane.b32.xlu1 %v2356_v38, %s3640_s17  ;;  %2088 = vset.pattern.permute.xlu0 %v3658_v7  ;;  %s3812_s17 = smov 114  }
  0xea   : > { %1405 = vperm.xlu0 %2088, %v2420_v48  }
  0xec   : > { %v2466_v54 = vpop.permute.xlu0 %798 }
  0xed   : > { %840 = vrot.lane.b32.xlu1 %v2354_v37, %s3622_s18 }
  0xee   : > { %2089 = vset.pattern.permute.xlu0 %v3626_v9 }
  0xef   : > { %1275 = vperm.xlu0 %2089, %v2412_v47  }
  0xf0   : > { %v2475_v56 = vpop.permute.xlu0 %823 }
  0xf1   : > { %842 = vrot.lane.b32.xlu1 %v2356_v38, %s3622_s18  ;;  %s3634_s18 = smov 97  }
  0xf3   : > { %1421 = vperm.xlu0 %2089, %v2420_v48  }
  0xf4   : > { %v2484_v59 = vpop.permute.xlu0 %848 }
  0xf5   : > { %865 = vrot.lane.b32.xlu1 %v2354_v37, %s3612_s20 }
  0xf7   : > { %2090 = vset.pattern.permute.xlu0 %v3659_v11 }
  0xf8   : > { %1437 = vperm.xlu0 %2090, %v2420_v48  }
  0xf9   : > { %867 = vrot.lane.b32.xlu1 %v2356_v38, %s3612_s20  ;;  %s3616_s20 = smov 113  }
  0xfc   : > { %2091 = vset.pattern.permute.xlu0 %v3651_v12 }
  0xfd   : > { %898 = vrot.lane.b32.xlu1 %v2354_v37, %s2150_s24  ;;  %1453 = vperm.xlu0 %2091, %v2420_v48  }
 0x101   : > { %925 = vrot.lane.b32.xlu1 %v2356_v38, %s2152_s28  ;;  %2092 = vset.pattern.permute.xlu0 %v3630_v13 }
 0x102   : > { %1323 = vperm.xlu0 %2092, %v2412_v47  }
 0x105   : > { %948 = vrot.lane.b32.xlu1 %v2354_v37, %s3614_s21 }
 0x106   : > { %1469 = vperm.xlu0 %2092, %v2420_v48  }
 0x109   : > { %950 = vrot.lane.b32.xlu1 %v2356_v38, %s3614_s21  ;;  %s3618_s21 = smov 112  }
 0x10a   : > { %2093 = vset.pattern.permute.xlu0 %v2139_v14  ;;  %v2495_v14 = vpop.permute.xlu0 %873 }
 0x10b   : > { %1485 = vperm.xlu0 %2093, %v2420_v48  }
 0x10d   : > { %973 = vrot.lane.b32.xlu1 %v2354_v37, %s3616_s20 }
 0x10f   : > { %2094 = vset.pattern.permute.xlu0 %v2140_v15 }
 0x110   : > { %1501 = vperm.xlu0 %2094, %v2420_v48  }
 0x111   : > { %975 = vrot.lane.b32.xlu1 %v2356_v38, %s3616_s20  ;;  %s3620_s20 = smov 111  }
 0x114   : > { %2095 = vset.pattern.permute.xlu0 %v2141_v16  ;;  %v2505_v16 = vpop.permute.xlu0 %931 }
 0x115   : > { %998 = vrot.lane.b32.xlu1 %v2354_v37, %s3618_s21  ;;  %1517 = vperm.xlu0 %2095, %v2420_v48   ;;  %3735 = vst [vmem:[#allocation11_spill] sm:$0xff] %v2505_v16 }
 0x117   : > { %v2497_v15 = vpop.permute.xlu1 %587 }
 0x119   : > { %1000 = vrot.lane.b32.xlu1 %v2356_v38, %s3618_s21  ;;  %2096 = vset.pattern.permute.xlu0 %v2142_v17  ;;  %v2515_v17 = vpop.permute.xlu0 %956  ;;  %s3624_s21 = smov 110  }
 0x11a   : > { %1533 = vperm.xlu0 %2096, %v2420_v48   ;;  %3736 = vst [vmem:[#allocation12_spill] sm:$0xff] %v2515_v17 }
 0x11b   : > { %v2503_v61 = vpop.permute.xlu1 %617 }
 0x11d   : > { %1023 = vrot.lane.b32.xlu1 %v2354_v37, %s3620_s20 }
 0x11e   : > { %2099 = vset.pattern.permute.xlu0 %v2143_v18  ;;  %v2524_v18 = vpop.permute.xlu0 %981 }
 0x11f   : > { %v2510_v62 = vpop.permute.xlu1 %640  ;;  %1573 = vperm.xlu0 %2099, %v2420_v48   ;;  %3737 = vst [vmem:[#allocation13_spill] sm:$0xff] %v2524_v18 }
 0x121   : > { %1025 = vrot.lane.b32.xlu1 %v2356_v38, %s3620_s20  ;;  %s3627_s20 = smov 98  }
 0x122   : > { %v2532_v6 = vpop.permute.xlu0 %1006 }
 0x123   : > { %v2517_v63 = vpop.permute.xlu1 %642  ;;  %2102 = vset.pattern.permute.xlu0 %v2146_v21  ;;  %3738 = vst [vmem:[#allocation14_spill] sm:$0xff] %v2532_v6 }
 0x125   : > { %1048 = vrot.lane.b32.xlu1 %v2354_v37, %s3624_s21 }
 0x126   : > { %v590_v30 = vpop.permute.xlu0 %589 }
 0x127   : > { %v2522_v0 = vpop.permute.xlu1 %665 }
 0x129   : > { %1050 = vrot.lane.b32.xlu1 %v2356_v38, %s3624_s21  ;;  %s3638_s21 = smov 96  }
 0x12a   : > { %v2546_v31 = vpop.permute.xlu0 %615 }
 0x12b   : > { %v2528_v1 = vpop.permute.xlu1 %667 }
 0x12d   : > { %1073 = vrot.lane.b32.xlu1 %v2354_v37, %s3627_s20 }
 0x12e   : > { %v2554_v36 = vpop.permute.xlu0 %900 }
 0x12f   : > { %v2534_v21 = vpop.permute.xlu1 %690 }
 0x131   : > { %1075 = vrot.lane.b32.xlu1 %v2356_v38, %s3627_s20  ;;  %s3666_s20 = smov 95  }
 0x132   : > { %v2562_v3 = vpop.permute.xlu0 %923 }
 0x133   : > { %v2538_v24 = vpop.permute.xlu1 %692  ;;  %3739 = vst [vmem:[#allocation15_spill] sm:$0xff] %v2562_v3 }
 0x135   : > { %1098 = vrot.lane.b32.xlu1 %v2354_v37, %s3634_s18 }
 0x136   : > { %v2568_v46 = vpop.permute.xlu0 %1031 }
 0x137   : > { %v2542_v27 = vpop.permute.xlu1 %715  ;;  %3740 = vst [vmem:[#allocation16_spill] sm:$0xff] %v2568_v46 }
 0x139   : > { %1100 = vrot.lane.b32.xlu1 %v2356_v38, %s3634_s18  ;;  %s3662_s18 = smov 94  }
 0x13a   : > { %v2576_v41 = vpop.permute.xlu0 %1056 }
 0x13b   : > { %v2548_v34 = vpop.permute.xlu1 %717  ;;  %3741 = vst [vmem:[#allocation17_spill] sm:$0xff] %v2576_v41  ;;  %v3750_v41 = vmov 0  }
 0x13d   : > { %1123 = vrot.lane.b32.xlu1 %v2354_v37, %s3638_s21 }
 0x13e   : > { %v2585_v22 = vpop.permute.xlu0 %1081 }
 0x13f   : > { %v2552_v35 = vpop.permute.xlu1 %740  ;;  %3742 = vst [vmem:[#allocation18_spill] sm:$0xff] %v2585_v22 }
 0x141   : > { %1125 = vrot.lane.b32.xlu1 %v2356_v38, %s3638_s21  ;;  %s3816_s21 = smov 111  }
 0x143   : > { %v2558_v9 = vpop.permute.xlu1 %742  ;;  %v2592_v10 = vpop.permute.xlu0 %1106 }
 0x144   : > { %3743 = vst [vmem:[#allocation19_spill] sm:$0xff] %v2592_v10 }
 0x145   : > { %1148 = vrot.lane.b32.xlu1 %v2354_v37, %s3666_s20 }
 0x147   : > { %v2564_v13 = vpop.permute.xlu1 %765 }
 0x148   : > { %v2598_v2 = vpop.permute.xlu0 %1131 }
 0x149   : > { %1150 = vrot.lane.b32.xlu1 %v2356_v38, %s3666_s20  ;;  %3744 = vst [vmem:[#allocation20_spill] sm:$0xff] %v2598_v2  ;;  %v3747_v2 = vmov 6   ;;  %s3811_s20 = smov 1  }
 0x14b   : > { %v2570_v45 = vpop.permute.xlu1 %767 }
 0x14d   : > { %1173 = vrot.lane.b32.xlu1 %v2354_v37, %s3662_s18  ;;  %v2607_v23 = vpop.permute.xlu0 %1156 }
 0x14e   : > { %3745 = vst [vmem:[#allocation21_spill] sm:$0xff] %v2607_v23  ;;  %v1343_v23 = vld [vmem:[%s3607_s9] sm:$0xff] }
 0x14f   : > { %v2574_v44 = vpop.permute.xlu1 %790 }
 0x151   : > { %1175 = vrot.lane.b32.xlu1 %v2356_v38, %s3662_s18  ;;  %s3808_s18 = smov 2  }
 0x153   : > { %v2583_v39 = vpop.permute.xlu1 %792 }
 0x155   : > { %1206 = vperm.xlu1 %2081, %v1203_v40  }
 0x157   : > { %v2587_v20 = vpop.permute.xlu1 %815 }
 0x159   : > { %1211 = vperm.xlu1 %2081, %v2412_v47  }
 0x15b   : > { %v2590_v19 = vpop.permute.xlu1 %817 }
 0x15d   : > { %2082 = vset.pattern.permute.xlu1 %v3654_v4  ;;  %v3746_v4 = vlaneseq }
 0x15e   : > { %1243 = vperm.xlu1 %2082, %v2412_v47  }
 0x15f   : > { %v2596_v8 = vpop.permute.xlu1 %840  ;;  %v2611_v10 = vand.u32 127, %v3746_v4  ;;  %v2629_v4 = vld [vmem:[%s3599_s1] sm:$0xff] }
 0x160   : > { %v2647_v18 = vrot.slane %v2629_v4, %v2320_v25 }
 0x161   : > { %vm593_vm0 = vcmp.lt.s32.totalorder %v2611_v10, 34  ;;  %vm619_vm1 = vcmp.lt.s32.totalorder %v2611_v10, 33  ;;  %vm644_vm2 = vcmp.lt.s32.totalorder %v2611_v10, 32  ;;  %vm669_vm3 = vcmp.lt.s32.totalorder %v2611_v10, 31 }
 0x162   : > { %2083 = vset.pattern.permute.xlu1 %v3658_v7  ;;  %v2617_v7 = vpop.permute.xlu0 %1181  ;;  %vm694_vm4 = vcmp.lt.s32.totalorder %v2611_v10, 30  ;;  %vm719_vm5 = vcmp.lt.s32.totalorder %v2611_v10, 18  ;;  %vm744_vm6 = vcmp.lt.s32.totalorder %v2611_v10, 17  ;;  %vm769_vm7 = vcmp.lt.s32.totalorder %v2611_v10, 16 }
 0x163   : > { %1259 = vperm.xlu1 %2083, %v2412_v47   ;;  %v2602_v40 = vpop.permute.xlu1 %842  ;;  %3748 = vst [vmem:[#allocation22_spill] sm:$0xff] %v2617_v7  ;;  %v595_v7 = vsel %vm593_vm0, %v590_v30, %v2497_v15  ;;  %vm794_vm8 = vcmp.lt.s32.totalorder %v2611_v10, 15  ;;  %vm819_vm9 = vcmp.lt.s32.totalorder %v2611_v10, 14  ;;  %vm844_vm10 = vcmp.lt.s32.totalorder %v2611_v10, 2 }
 0x164   : > { %v601_v16 = vmul.f32 %v2471_v55, %v595_v7  ;;  %vm869_vm11 = vcmp.lt.s32.totalorder %v2611_v10, 1  ;;  %vm3696_vm12 = vcmp.lt.s32.totalorder %v2611_v10, 127  ;;  %vm3687_vm13 = vcmp.lt.s32.totalorder %v2611_v10, 126 }
 0x165   : > { %vm3695_vm14 = vcmp.lt.s32.totalorder %v2611_v10, 114  ;;  %vm977_vm15 = vcmp.lt.s32.totalorder %v2611_v10, 113 }
 0x166   : > { %v624_v6 = vpop.permute.xlu0 %623  ;;  %v611_v60 = vmul.f32 %v2647_v18, %v601_v16 }
 0x167   : > { %2084 = vset.pattern.permute.xlu1 %v3659_v11  ;;  %v2605_v12 = vpop.permute.xlu1 %865 }
 0x168   : > { %1291 = vperm.xlu1 %2084, %v2412_v47  }
 0x16b   : > { %v2613_v22 = vpop.permute.xlu1 %867 }
 0x16c   : > { %2085 = vset.pattern.permute.xlu1 %v3747_v2  ;;  %v594_v2 = vsel %vm593_vm0, %v2497_v15, %v590_v30  ;;  %v621_v15 = vsel %vm619_vm1, %v2503_v61, %v2546_v31  ;;  %v2667_v30 = vrot.slane %v2629_v4, %v2324_v28 }
 0x16d   : > { %1307 = vperm.xlu1 %2085, %v2412_v47   ;;  %v2634_v47 = vld [vmem:[%s3599_s1 + $0x8] sm:$0xff]  ;;  %v602_v3 = vmul.f32 %v2471_v55, %v594_v2  ;;  %v626_v7 = vmul.f32 %v624_v6, %v621_v15 }
 0x16e   : > { %v2651_v17 = vrot.slane %v2634_v47, %v2320_v25  ;;  %3753 = vst [vmem:[#allocation26_spill] sm:$0xff] %v2667_v30  ;;  %v2671_v2 = vrot.slane %v2634_v47, %v2324_v28  ;;  %v2698_v15 = vrot.slane %v2634_v47, %v2330_v32 }
 0x16f   : > { %v2620_v11 = vpop.permute.xlu1 %898 }
 0x170   : > { %3749 = vst [vmem:[#allocation23_spill] sm:$0xff] %v2620_v11  ;;  %3752 = vst [vmem:[#allocation25_spill] sm:$0xff] %v2651_v17  ;;  %v612_v38 = vmul.f32 %v2651_v17, %v602_v3  ;;  %v3755_v11 = vmov 12  }
 0x171   : > { %2086 = vset.pattern.permute.xlu1 %v3750_v41  ;;  %3754 = vst [vmem:[#allocation27_spill] sm:$0xff] %v2671_v2 }
 0x172   : > { %1346 = vperm.xlu1 %2086, %v1343_v23   ;;  %v620_v23 = vsel %vm619_vm1, %v2546_v31, %v2503_v61  ;;  %v645_v61 = vsel %vm644_vm2, %v2510_v62, %v2517_v63  ;;  %v646_v31 = vsel %vm644_vm2, %v2517_v63, %v2510_v62  ;;  %v613_v63 = vadd.f32 %v611_v60, %v2460_v53 }
 0x173   : > { %v2643_v46 = vpop.permute.xlu1 %925  ;;  %v627_v55 = vmul.f32 %v624_v6, %v620_v23  ;;  %v636_v6 = vmul.f32 %v2667_v30, %v626_v7  ;;  %v2694_v23 = vrot.slane %v2629_v4, %v2330_v32  ;;  %v652_v62 = vmul.f32 %v2350_v58, %v645_v61 }
 0x174   : > { %3751 = vst [vmem:[#allocation24_spill] sm:$0xff] %v2643_v46  ;;  %v614_v7 = vadd.f32 %v612_v38, %v2460_v53  ;;  %v2718_v38 = vrot.slane %v2629_v4, %v2340_v42  ;;  %v2722_v53 = vrot.slane %v2634_v47, %v2340_v42 }
 0x175   : > { %v637_v16 = vmul.f32 %v2671_v2, %v627_v55  ;;  %v670_v55 = vsel %vm669_vm3, %v2522_v0, %v2528_v1  ;;  %v671_v2 = vsel %vm669_vm3, %v2528_v1, %v2522_v0  ;;  %v638_v30 = vadd.f32 %v636_v6, %v613_v63 }
 0x176   : > { %1357 = vperm.xlu1 %2086, %v2420_v48   ;;  %v662_v0 = vmul.f32 %v2698_v15, %v652_v62  ;;  %v676_v1 = vmul.f32 %v2429_v5, %v671_v2  ;;  %v677_v61 = vmul.f32 %v2429_v5, %v670_v55  ;;  %v695_v6 = vsel %vm694_vm4, %v2534_v21, %v2538_v24 }
 0x177   : > { %v2673_v46 = vpop.permute.xlu1 %948  ;;  %v2742_v2 = vrot.slane %v2629_v4, %v2322_v26  ;;  %v2746_v5 = vrot.slane %v2634_v47, %v2322_v26  ;;  %v3757_v62 = vmov 15  }
 0x178   : > { %v686_v55 = vmul.f32 %v2718_v38, %v676_v1 }
 0x17a   : > { %2097 = vset.pattern.permute.xlu1 %v3755_v11  ;;  %v651_v11 = vmul.f32 %v2350_v58, %v646_v31  ;;  %v639_v31 = vadd.f32 %v637_v16, %v614_v7  ;;  %v3756_v58 = vmov 13   ;;  %v696_v16 = vsel %vm694_vm4, %v2538_v24, %v2534_v21 }
 0x17b   : > { %1543 = vperm.xlu1 %2097, %v2420_v48   ;;  %v2690_v3 = vpop.permute.xlu1 %950  ;;  %v687_v21 = vmul.f32 %v2722_v53, %v677_v61  ;;  %v701_v24 = vmul.f32 %v2435_v49, %v696_v16  ;;  %v2771_v61 = vrot.slane %v2634_v47, %v2326_v29 }
 0x17c   : > { %v661_v60 = vmul.f32 %v2694_v23, %v651_v11  ;;  %v664_v11 = vadd.f32 %v662_v0, %v639_v31  ;;  %v720_v31 = vsel %vm719_vm5, %v2542_v27, %v2548_v34 }
 0x17e   : > { %v663_v63 = vadd.f32 %v661_v60, %v638_v30  ;;  %v702_v30 = vmul.f32 %v2435_v49, %v695_v6  ;;  %v689_v0 = vadd.f32 %v687_v21, %v664_v11  ;;  %v2767_v49 = vrot.slane %v2629_v4, %v2326_v29 }
 0x17f   : > { %v2713_v17 = vpop.permute.xlu1 %973  ;;  %2098 = vset.pattern.permute.xlu1 %v3756_v58  ;;  %v721_v58 = vsel %vm719_vm5, %v2548_v34, %v2542_v27  ;;  %v711_v6 = vmul.f32 %v2742_v2, %v701_v24  ;;  %v727_v34 = vmul.f32 %v2443_v50, %v720_v31  ;;  %v745_v11 = vsel %vm744_vm6, %v2552_v35, %v2558_v9 }
 0x180   : > { %1557 = vperm.xlu1 %2098, %v2420_v48   ;;  %v688_v60 = vadd.f32 %v686_v55, %v663_v63  ;;  %v712_v16 = vmul.f32 %v2746_v5, %v702_v30  ;;  %v726_v27 = vmul.f32 %v2443_v50, %v721_v58  ;;  %v3758_v63 = vmov 16  }
 0x181   : > { %v2792_v50 = vrot.slane %v2629_v4, %v2332_v33  ;;  %v2796_v30 = vrot.slane %v2634_v47, %v2332_v33  ;;  %v770_v58 = vsel %vm769_vm7, %v2564_v13, %v2570_v45 }
 0x182   : > { %v713_v55 = vadd.f32 %v711_v6, %v688_v60  ;;  %v714_v21 = vadd.f32 %v712_v16, %v689_v0  ;;  %v736_v31 = vmul.f32 %v2767_v49, %v726_v27  ;;  %v771_v60 = vsel %vm769_vm7, %v2570_v45, %v2564_v13 }
 0x183   : > { %v2738_v7 = vpop.permute.xlu1 %975  ;;  %v2820_v27 = vrot.slane %v2634_v47, %v2342_v43  ;;  %v776_v45 = vmul.f32 %v2458_v52, %v771_v60  ;;  %v795_v47 = vsel %vm794_vm8, %v2574_v44, %v2583_v39  ;;  %v821_v60 = vsel %vm819_vm9, %v2590_v19, %v2587_v20 }
 0x184   : > { %2100 = vset.pattern.permute.xlu1 %v3757_v62  ;;  %v746_v62 = vsel %vm744_vm6, %v2558_v9, %v2552_v35  ;;  %v737_v9 = vmul.f32 %v2771_v61, %v727_v34  ;;  %v752_v35 = vmul.f32 %v2449_v51, %v745_v11  ;;  %v738_v0 = vadd.f32 %v736_v31, %v713_v55  ;;  %v2829_v11 = vld [vmem:[%s3599_s1 + $0x10] sm:$0xff] }
 0x185   : > { %1589 = vperm.xlu1 %2100, %v2420_v48   ;;  %3760 = vst [vmem:[#allocation29_spill] sm:$0xff] %v2820_v27  ;;  %v2849_v31 = vrot.slane %v2829_v11, %v2320_v25 }
 0x186   : > { %v739_v6 = vadd.f32 %v737_v9, %v714_v21  ;;  %v762_v13 = vmul.f32 %v2796_v30, %v752_v35 }
 0x187   : > { %v2763_v1 = vpop.permute.xlu1 %998  ;;  %3761 = vst [vmem:[#allocation30_spill] sm:$0xff] %v2849_v31 }
 0x188   : > { %v764_v55 = vadd.f32 %v762_v13, %v739_v6  ;;  %v2872_v13 = vrot.slane %v2829_v11, %v2324_v28 }
 0x189   : > { %2101 = vset.pattern.permute.xlu1 %v3758_v63  ;;  %v777_v63 = vmul.f32 %v2458_v52, %v770_v58  ;;  %v796_v52 = vsel %vm794_vm8, %v2583_v39, %v2574_v44  ;;  %v802_v44 = vmul.f32 %v2466_v54, %v795_v47  ;;  %v820_v58 = vsel %vm819_vm9, %v2587_v20, %v2590_v19 }
 0x18a   : > { %1605 = vperm.xlu1 %2101, %v2420_v48   ;;  %v751_v48 = vmul.f32 %v2449_v51, %v746_v62  ;;  %v2816_v51 = vrot.slane %v2629_v4, %v2342_v43  ;;  %v2834_v4 = vld [vmem:[%s3599_s1 + $0x18] sm:$0xff]  ;;  %v801_v39 = vmul.f32 %v2466_v54, %v796_v52  ;;  %3763 = vst [vmem:[#allocation32_spill] sm:$0xff] %v2872_v13 }
 0x18b   : > { %v2788_v24 = vpop.permute.xlu1 %1000  ;;  %v2853_v9 = vrot.slane %v2834_v4, %v2320_v25  ;;  %v787_v35 = vmul.f32 %v2820_v27, %v777_v63  ;;  %v2876_v54 = vrot.slane %v2834_v4, %v2324_v28  ;;  %v826_v20 = vmul.f32 %v2475_v56, %v821_v60  ;;  %v3779_v27 = vld [vmem:[#allocation12_spill] sm:$0xff] }
 0x18c   : > { %3759 = vst [vmem:[#allocation28_spill] sm:$0xff] %v2816_v51  ;;  %v761_v34 = vmul.f32 %v2792_v50, %v751_v48  ;;  %v786_v48 = vmul.f32 %v2816_v51, %v776_v45  ;;  %v811_v45 = vmul.f32 %v2849_v31, %v801_v39  ;;  %v827_v63 = vmul.f32 %v2475_v56, %v820_v58 }
 0x18d   : > { %3762 = vst [vmem:[#allocation31_spill] sm:$0xff] %v2853_v9  ;;  %v789_v6 = vadd.f32 %v787_v35, %v764_v55  ;;  %3764 = vst [vmem:[#allocation33_spill] sm:$0xff] %v2876_v54  ;;  %v812_v19 = vmul.f32 %v2853_v9, %v802_v44  ;;  %v845_v47 = vsel %vm844_vm10, %v2596_v8, %v2602_v40 }
 0x18e   : > { %2111 = vset.pattern.permute.xlu1 %v3750_v41  ;;  %v763_v62 = vadd.f32 %v761_v34, %v738_v0  ;;  %v846_v52 = vsel %vm844_vm10, %v2602_v40, %v2596_v8  ;;  %v2895_v35 = vrot.slane %v2829_v11, %v2330_v32  ;;  %v2899_v56 = vrot.slane %v2834_v4, %v2330_v32 }
 0x18f   : > { %v2812_v16 = vpop.permute.xlu1 %1023  ;;  %v814_v55 = vadd.f32 %v812_v19, %v789_v6  ;;  %v870_v39 = vsel %vm869_vm11, %v2605_v12, %v2613_v22  ;;  %v871_v8 = vsel %vm869_vm11, %v2613_v22, %v2605_v12  ;;  %v836_v40 = vmul.f32 %v2872_v13, %v826_v20 }
 0x190   : > { %v788_v0 = vadd.f32 %v786_v48, %v763_v62  ;;  %3765 = vst [vmem:[#allocation34_spill] sm:$0xff] %v2895_v35  ;;  %3766 = vst [vmem:[#allocation35_spill] sm:$0xff] %v2899_v56  ;;  %v837_v44 = vmul.f32 %v2876_v54, %v827_v63  ;;  %v851_v58 = vmul.f32 %v2484_v59, %v846_v52 }
 0x191   : > { %v852_v60 = vmul.f32 %v2484_v59, %v845_v47  ;;  %v2919_v6 = vrot.slane %v2834_v4, %v2340_v42  ;;  %v876_v12 = vmul.f32 %v2495_v14, %v871_v8  ;;  %v877_v22 = vmul.f32 %v2495_v14, %v870_v39  ;;  %v3769_v14 = vld [vmem:[#allocation23_spill] sm:$0xff] }
 0x192   : > { %v813_v62 = vadd.f32 %v811_v45, %v788_v0  ;;  %v2915_v0 = vrot.slane %v2829_v11, %v2340_v42  ;;  %v839_v19 = vadd.f32 %v837_v44, %v814_v55  ;;  %v861_v63 = vmul.f32 %v2895_v35, %v851_v58 }
 0x193   : > { %v2845_v21 = vpop.permute.xlu1 %1025  ;;  %3768 = vst [vmem:[#allocation37_spill] sm:$0xff] %v2919_v6  ;;  %v862_v59 = vmul.f32 %v2899_v56, %v852_v60  ;;  %v887_v13 = vmul.f32 %v2919_v6, %v877_v22  ;;  %v894_v55 = vmul.f32 %v2479_v57, %v2354_v37  ;;  %v903_v39 = vsel %vm3696_vm12, %v3769_v14, %v2554_v36 }
 0x194   : > { %3767 = vst [vmem:[#allocation36_spill] sm:$0xff] %v2915_v0  ;;  %v838_v45 = vadd.f32 %v836_v40, %v813_v62  ;;  %v886_v54 = vmul.f32 %v2915_v0, %v876_v12  ;;  %v904_v8 = vsel %vm3696_vm12, %v2554_v36, %v3769_v14  ;;  %v3770_v40 = vld [vmem:[#allocation9_spill] sm:$0xff]  ;;  %v2947_v58 = vrot.slane %v2829_v11, %v2326_v29  ;;  %v2960_v36 = vld [vmem:[%s3599_s1 + $0x20] sm:$0xff]  ;;  %v2970_v12 = vld [vmem:[%s3599_s1 + $0x28] sm:$0xff] }
 0x195   : > { %v864_v52 = vadd.f32 %v862_v59, %v839_v19  ;;  %v895_v44 = vmul.f32 %v2479_v57, %v3770_v40  ;;  %v2951_v37 = vrot.slane %v2834_v4, %v2326_v29  ;;  %v2955_v60 = vrot.slane %v2829_v11, %v2332_v33  ;;  %v3775_v40 = vld [vmem:[#allocation24_spill] sm:$0xff] }
 0x196   : > { %v863_v47 = vadd.f32 %v861_v63, %v838_v45  ;;  %v2964_v57 = vrot.slane %v2834_v4, %v2332_v33  ;;  %v3774_v63 = vld [vmem:[#allocation10_spill] sm:$0xff]  ;;  %v2990_v6 = vrot.slane %v2834_v4, %v2342_v43  ;;  %v3007_v4 = vrot.slane %v2970_v12, %v2320_v25 }
 0x197   : > { %v2868_v34 = vpop.permute.xlu1 %1048  ;;  %3771 = vst [vmem:[#allocation23_spill] sm:$0xff] %v2951_v37  ;;  %3772 = vst [vmem:[#allocation9_spill] sm:$0xff] %v2955_v60  ;;  %v889_v19 = vadd.f32 %v887_v13, %v864_v52  ;;  %v909_v59 = vmul.f32 %v3774_v63, %v903_v39  ;;  %v910_v14 = vmul.f32 %v3774_v63, %v904_v8  ;;  %v3778_v63 = vld [vmem:[#allocation11_spill] sm:$0xff]  ;;  %vm3703_vm12 = vcmp.lt.s32.totalorder %v2611_v10, 110 }
 0x198   : > { %v888_v45 = vadd.f32 %v886_v54, %v863_v47  ;;  %3773 = vst [vmem:[#allocation38_spill] sm:$0xff] %v2964_v57  ;;  %v3776_v54 = vld [vmem:[#allocation15_spill] sm:$0xff]  ;;  %v2986_v52 = vrot.slane %v2829_v11, %v2342_v43  ;;  %v2995_v39 = vrot.slane %v2960_v36, %v2320_v25  ;;  %v953_v8 = vsel %vm3695_vm14, %v2673_v46, %v2690_v3 }
 0x199   : > { %v928_v13 = vsel %vm3687_vm13, %v3776_v54, %v3775_v40  ;;  %v929_v47 = vsel %vm3687_vm13, %v3775_v40, %v3776_v54  ;;  %v954_v11 = vsel %vm3695_vm14, %v2690_v3, %v2673_v46  ;;  %3777 = vst [vmem:[#allocation10_spill] sm:$0xff] %v3007_v4  ;;  %vm3700_vm13 = vcmp.lt.s32.totalorder %v2611_v10, 112 }
 0x19a   : > { %v934_v40 = vmul.f32 %v3778_v63, %v928_v13  ;;  %v935_v54 = vmul.f32 %v3778_v63, %v929_v47  ;;  %v3014_v0 = vrot.slane %v2960_v36, %v2324_v28  ;;  %v3018_v56 = vrot.slane %v2970_v12, %v2324_v28 }
 0x19b   : > { %v2891_v48 = vpop.permute.xlu1 %1050  ;;  %v897_v46 = vadd.f32 %v895_v44, %v889_v19  ;;  %v896_v3 = vadd.f32 %v894_v55, %v888_v45  ;;  %v919_v9 = vmul.f32 %v2947_v58, %v909_v59  ;;  %v920_v31 = vmul.f32 %v2951_v37, %v910_v14  ;;  %v3780_v59 = vld [vmem:[#allocation13_spill] sm:$0xff] }
 0x19c   : > { %v959_v51 = vmul.f32 %v3779_v27, %v953_v8  ;;  %v960_v13 = vmul.f32 %v3779_v27, %v954_v11  ;;  %v978_v47 = vsel %vm977_vm15, %v2713_v17, %v2738_v7  ;;  %v979_v63 = vsel %vm977_vm15, %v2738_v7, %v2713_v17 }
 0x19d   : > { %vm3701_vm14 = vcmp.lt.s32.totalorder %v2611_v10, 111  ;;  %v3035_v55 = vrot.slane %v2960_v36, %v2330_v32  ;;  %v3039_v44 = vrot.slane %v2970_v12, %v2330_v32  ;;  %v944_v27 = vmul.f32 %v2955_v60, %v934_v40 }
 0x19e   : > { %v945_v45 = vmul.f32 %v2964_v57, %v935_v54  ;;  %v1003_v17 = vsel %vm3700_vm13, %v2763_v1, %v2788_v24  ;;  %v1004_v7 = vsel %vm3700_vm13, %v2788_v24, %v2763_v1  ;;  %v984_v14 = vmul.f32 %v3780_v59, %v978_v47  ;;  %v3781_v1 = vld [vmem:[#allocation14_spill] sm:$0xff] }
 0x19f   : > { %v2923_v20 = vpop.permute.xlu1 %1073  ;;  %v985_v8 = vmul.f32 %v3780_v59, %v979_v63  ;;  %v3056_v11 = vrot.slane %v2960_v36, %v2340_v42  ;;  %v3060_v40 = vrot.slane %v2970_v12, %v2340_v42  ;;  %v921_v54 = vadd.f32 %v919_v9, %v896_v3 }
 0x1a0   : > { %v922_v57 = vadd.f32 %v920_v31, %v897_v46  ;;  %v969_v60 = vmul.f32 %v2986_v52, %v959_v51  ;;  %v970_v37 = vmul.f32 %v2990_v6, %v960_v13  ;;  %v1009_v24 = vmul.f32 %v3781_v1, %v1003_v17 }
 0x1a1   : > { %v1010_v47 = vmul.f32 %v3781_v1, %v1004_v7  ;;  %v1028_v63 = vsel %vm3701_vm14, %v2812_v16, %v2845_v21  ;;  %v1029_v59 = vsel %vm3701_vm14, %v2845_v21, %v2812_v16  ;;  %v946_v9 = vadd.f32 %v944_v27, %v921_v54  ;;  %v3782_v21 = vld [vmem:[#allocation16_spill] sm:$0xff]  ;;  %v3783_v1 = vld [vmem:[#allocation17_spill] sm:$0xff] }
 0x1a2   : > { %v947_v31 = vadd.f32 %v945_v45, %v922_v57  ;;  %vm3704_vm13 = vcmp.lt.s32.totalorder %v2611_v10, 98  ;;  %v3077_v51 = vrot.slane %v2960_v36, %v2322_v26  ;;  %v994_v3 = vmul.f32 %v2995_v39, %v984_v14 }
 0x1a3   : > { %v2930_v62 = vpop.permute.xlu1 %1075  ;;  %v995_v13 = vmul.f32 %v3007_v4, %v985_v8  ;;  %v1053_v17 = vsel %vm3703_vm12, %v2868_v34, %v2891_v48  ;;  %v1054_v16 = vsel %vm3703_vm12, %v2891_v48, %v2868_v34  ;;  %v1034_v57 = vmul.f32 %v3782_v21, %v1028_v63 }
 0x1a4   : > { %v1035_v27 = vmul.f32 %v3782_v21, %v1029_v59  ;;  %v3093_v45 = vrot.slane %v2970_v12, %v2322_v26  ;;  %vm1102_vm14 = vcmp.lt.s32.totalorder %v2611_v10, 97  ;;  %v971_v7 = vadd.f32 %v969_v60, %v946_v9 }
 0x1a5   : > { %v972_v14 = vadd.f32 %v970_v37, %v947_v31  ;;  %v1019_v8 = vmul.f32 %v3014_v0, %v1009_v24  ;;  %v1020_v54 = vmul.f32 %v3018_v56, %v1010_v47  ;;  %v1059_v4 = vmul.f32 %v3783_v1, %v1053_v17 }
 0x1a6   : > { %v1060_v34 = vmul.f32 %v3783_v1, %v1054_v16  ;;  %v1078_v48 = vsel %vm3704_vm13, %v2923_v20, %v2930_v62  ;;  %v1079_v63 = vsel %vm3704_vm13, %v2930_v62, %v2923_v20  ;;  %v996_v37 = vadd.f32 %v994_v3, %v971_v7  ;;  %v3784_v62 = vld [vmem:[#allocation18_spill] sm:$0xff] }
 0x1a7   : > { %v2972_v22 = vpop.permute.xlu1 %1098  ;;  %v997_v59 = vadd.f32 %v995_v13, %v972_v14  ;;  %v3110_v24 = vrot.slane %v2960_v36, %v2326_v29  ;;  %vm1127_vm12 = vcmp.lt.s32.totalorder %v2611_v10, 96  ;;  %v1044_v47 = vmul.f32 %v3035_v55, %v1034_v57  ;;  %v3785_v14 = vld [vmem:[#allocation19_spill] sm:$0xff] }
 0x1a8   : > { %v1045_v9 = vmul.f32 %v3039_v44, %v1035_v27  ;;  %v1084_v3 = vmul.f32 %v3784_v62, %v1078_v48  ;;  %v1085_v13 = vmul.f32 %v3784_v62, %v1079_v63  ;;  %v3125_v17 = vrot.slane %v2970_v12, %v2326_v29 }
 0x1a9   : > { %vm3705_vm13 = vcmp.lt.s32.totalorder %v2611_v10, 95  ;;  %v1021_v16 = vadd.f32 %v1019_v8, %v996_v37  ;;  %v1022_v21 = vadd.f32 %v1020_v54, %v997_v59  ;;  %v1069_v57 = vmul.f32 %v3056_v11, %v1059_v4  ;;  %v3140_v4 = vpop.permute.xlu0 %1227 }
 0x1aa   : > { %v1070_v27 = vmul.f32 %v3060_v40, %v1060_v34  ;;  %v3138_v8 = vrot.slane %v2960_v36, %v2332_v33  ;;  %v1094_v54 = vmul.f32 %v3077_v51, %v1084_v3  ;;  %v1095_v34 = vmul.f32 %v3093_v45, %v1085_v13 }
 0x1ab   : > { %v1101_v35 = vpop.permute.xlu1 %1100  ;;  %v1046_v63 = vadd.f32 %v1044_v47, %v1021_v16  ;;  %v1047_v62 = vadd.f32 %v1045_v9, %v1022_v21 }
 0x1ac   : > { %v1103_v31 = vsel %vm1102_vm14, %v2972_v22, %v1101_v35  ;;  %v1104_v20 = vsel %vm1102_vm14, %v1101_v35, %v2972_v22  ;;  %3786 = vst [vmem:[#allocation24_spill] sm:$0xff] %v3138_v8 }
 0x1ad   : > { %v1109_v1 = vmul.f32 %v3785_v14, %v1103_v31  ;;  %v1110_v35 = vmul.f32 %v3785_v14, %v1104_v20  ;;  %v3156_v31 = vrot.slane %v2960_v36, %v2342_v43  ;;  %v1071_v3 = vadd.f32 %v1069_v57, %v1046_v63 }
 0x1ae   : > { %v1072_v13 = vadd.f32 %v1070_v27, %v1047_v62  ;;  %v3179_v62 = vld [vmem:[%s3599_s1 + $0x38] ss:$0 sm:$0xff] }
 0x1af   : > { %v1124_v19 = vpop.permute.xlu1 %1123  ;;  %3789 = vst [vmem:[#allocation11_spill] sm:$0xff] %v3156_v31  ;;  %v1119_v16 = vmul.f32 %v3110_v24, %v1109_v1  ;;  %v1120_v21 = vmul.f32 %v3125_v17, %v1110_v35  ;;  %v3169_v1 = vpop.permute.xlu0 %1373  ;;  %3793 = vst [vmem:[#allocation14_spill] sm:$0xff] %v3179_v62 }
 0x1b0   : > { %v1097_v36 = vadd.f32 %v1095_v34, %v1072_v13 }
 0x1b2   : > { %v1122_v63 = vadd.f32 %v1120_v21, %v1097_v36 }
 0x1b3   : > { %v1126_v46 = vpop.permute.xlu1 %1125 }
 0x1b4   : > { %v1128_v22 = vsel %vm1127_vm12, %v1124_v19, %v1126_v46  ;;  %v1129_v48 = vsel %vm1127_vm12, %v1126_v46, %v1124_v19  ;;  %v3150_v19 = vrot.slane %v2970_v12, %v2332_v33  ;;  %v3788_v46 = vld [vmem:[#allocation20_spill] sm:$0xff] }
 0x1b5   : > { %v1134_v47 = vmul.f32 %v3788_v46, %v1128_v22  ;;  %v1135_v9 = vmul.f32 %v3788_v46, %v1129_v48  ;;  %v1096_v48 = vadd.f32 %v1094_v54, %v1071_v3 }
 0x1b6   : > { %3787 = vst [vmem:[#allocation15_spill] sm:$0xff] %v3150_v19 }
 0x1b7   : > { %v1149_v60 = vpop.permute.xlu1 %1148  ;;  %v1144_v46 = vmul.f32 %v3138_v8, %v1134_v47  ;;  %v1145_v57 = vmul.f32 %v3150_v19, %v1135_v9  ;;  %v1121_v35 = vadd.f32 %v1119_v16, %v1096_v48  ;;  %v3794_v47 = vld [vmem:[#allocation22_spill] sm:$0xff]  ;;  %v3191_v48 = vpop.permute.xlu0 %1389 }
 0x1b9   : > { %v1146_v13 = vadd.f32 %v1144_v46, %v1121_v35  ;;  %v1147_v16 = vadd.f32 %v1145_v57, %v1122_v63 }
 0x1bb   : > { %v1151_v7 = vpop.permute.xlu1 %1150 }
 0x1bc   : > { %v1153_v37 = vsel %vm3705_vm13, %v1149_v60, %v1151_v7  ;;  %v1154_v59 = vsel %vm3705_vm13, %v1151_v7, %v1149_v60  ;;  %v3162_v60 = vrot.slane %v2970_v12, %v2342_v43  ;;  %v3791_v7 = vld [vmem:[#allocation21_spill] sm:$0xff]  ;;  %vm1177_vm13 = vcmp.lt.s32.totalorder %v2611_v10, 94  ;;  %v3174_v12 = vld [vmem:[%s3599_s1 + $0x30] ss:$0 sm:$0xff] }
 0x1bd   : > { %v1159_v14 = vmul.f32 %v3791_v7, %v1153_v37  ;;  %v1160_v22 = vmul.f32 %v3791_v7, %v1154_v59  ;;  %3792 = vst [vmem:[#allocation13_spill] sm:$0xff] %v3174_v12 }
 0x1be   : > { %3790 = vst [vmem:[#allocation12_spill] sm:$0xff] %v3162_v60 }
 0x1bf   : > { %v1174_v20 = vpop.permute.xlu1 %1173  ;;  %v1169_v37 = vmul.f32 %v3156_v31, %v1159_v14  ;;  %v1170_v59 = vmul.f32 %v3162_v60, %v1160_v22 }
 0x1c1   : > { %v1171_v36 = vadd.f32 %v1169_v37, %v1146_v13  ;;  %v1172_v19 = vadd.f32 %v1170_v59, %v1147_v16 }
 0x1c3   : > { %v1176_v27 = vpop.permute.xlu1 %1175 }
 0x1c4   : > { %v1178_v54 = vsel %vm1177_vm13, %v1174_v20, %v1176_v27  ;;  %v1179_v34 = vsel %vm1177_vm13, %v1176_v27, %v1174_v20  ;;  %v3193_v27 = vpop.permute.xlu0 %1405 }
 0x1c5   : > { %v1184_v9 = vmul.f32 %v3794_v47, %v1178_v54  ;;  %v1185_v3 = vmul.f32 %v3794_v47, %v1179_v34 }
 0x1c7   : > { %v1194_v21 = vmul.f32 %v3174_v12, %v1184_v9  ;;  %v1195_v7 = vmul.f32 %v3179_v62, %v1185_v3 }
 0x1c8   : > { %v1276_v31 = vpop.permute.xlu0 %1275 }
 0x1c9   : > { %v1196_v8 = vadd.f32 %v1194_v21, %v1171_v36  ;;  %v1197_v20 = vadd.f32 %v1195_v7, %v1172_v19 }
 0x1cb   : > { %v1198_v14 = vmul.f32 0.1, %v1196_v8  ;;  %v1199_v22 = vmul.f32 0.1, %v1197_v20 }
 0x1cc   : > { %v3199_v19 = vpop.permute.xlu0 %1421 }
 0x1cd   : > { %v1200_v60 = vmax.f32 %v1196_v8, %v1198_v14  ;;  %v1201_v54 = vmax.f32 %v1197_v20, %v1199_v22 }
 0x1cf   : > { %v1221_v46 = vrot.slane %v1201_v54, %v2320_v25  ;;  %v1217_v57 = vrot.slane %v1200_v60, %v2320_v25  ;;  %v1237_v37 = vrot.slane %v1201_v54, %v2324_v28  ;;  %v1233_v59 = vrot.slane %v1200_v60, %v2324_v28 }
 0x1d0   : > { %v1253_v13 = vrot.slane %v1201_v54, %v2330_v32  ;;  %v1249_v7 = vrot.slane %v1200_v60, %v2330_v32 }
 0x1d1   : > { %v1239_v8 = vmul.f32 %v1237_v37, %v3140_v4  ;;  %v1238_v21 = vmul.f32 %v1233_v59, %v3140_v4 }
 0x1d4   : > { %v1207_v34 = vpop.permute.xlu1 %1206 }
 0x1d8   : > { %v1212_v35 = vpop.permute.xlu1 %1211 }
 0x1d9   : > { %v1222_v63 = vmul.f32 %v1217_v57, %v1212_v35  ;;  %v1223_v47 = vmul.f32 %v1221_v46, %v1212_v35  ;;  %v3205_v46 = vpop.permute.xlu0 %1437  ;;  %v1269_v57 = vrot.slane %v1201_v54, %v2340_v42  ;;  %v1265_v35 = vrot.slane %v1200_v60, %v2340_v42 }
 0x1db   : > { %v1224_v9 = vadd.f32 %v1222_v63, %v1207_v34  ;;  %v1225_v3 = vadd.f32 %v1223_v47, %v1207_v34  ;;  %v1285_v63 = vrot.slane %v1201_v54, %v2322_v26  ;;  %v1281_v47 = vrot.slane %v1200_v60, %v2322_v26 }
 0x1dd   : > { %v1244_v16 = vpop.permute.xlu1 %1243  ;;  %v1241_v36 = vadd.f32 %v1239_v8, %v1225_v3  ;;  %v1240_v20 = vadd.f32 %v1238_v21, %v1224_v9  ;;  %v3211_v9 = vpop.permute.xlu0 %1453  ;;  %v1287_v8 = vmul.f32 %v1285_v63, %v1276_v31  ;;  %v1286_v21 = vmul.f32 %v1281_v47, %v1276_v31 }
 0x1de   : > { %v1254_v14 = vmul.f32 %v1249_v7, %v1244_v16  ;;  %v1255_v22 = vmul.f32 %v1253_v13, %v1244_v16  ;;  %v1301_v13 = vrot.slane %v1201_v54, %v2326_v29  ;;  %v1297_v7 = vrot.slane %v1200_v60, %v2326_v29 }
 0x1e0   : > { %v1256_v37 = vadd.f32 %v1254_v14, %v1240_v20  ;;  %v1257_v28 = vadd.f32 %v1255_v22, %v1241_v36  ;;  %v1329_v20 = vrot.slane %v1200_v60, %v2342_v43  ;;  %v1333_v36 = vrot.slane %v1201_v54, %v2342_v43 }
 0x1e1   : > { %v1317_v14 = vrot.slane %v1201_v54, %v2332_v33  ;;  %v1324_v22 = vpop.permute.xlu0 %1323  ;;  %v3799_v54 = vmov 22  }
 0x1e2   : > { %v1260_v34 = vpop.permute.xlu1 %1259  ;;  %v1334_v47 = vmul.f32 %v1329_v20, %v1324_v22  ;;  %v3802_v20 = vmov 24  }
 0x1e3   : > { %v1270_v4 = vmul.f32 %v1265_v35, %v1260_v34  ;;  %v1271_v59 = vmul.f32 %v1269_v57, %v1260_v34 }
 0x1e5   : > { %v1272_v32 = vadd.f32 %v1270_v4, %v1256_v37  ;;  %v1273_v3 = vadd.f32 %v1271_v59, %v1257_v28  ;;  %v1313_v28 = vrot.slane %v1200_v60, %v2332_v33  ;;  %v1335_v37 = vmul.f32 %v1333_v36, %v1324_v22  ;;  %v3281_v36 = vld [vmem:[%s3608_s10] sm:$0xff]  ;;  %v3297_v22 = vpop.permute.xlu0 %1469 }
 0x1e6   : > { %v3796_v60 = vmov 19  }
 0x1e7   : > { %v1292_v16 = vpop.permute.xlu1 %1291  ;;  %v1289_v42 = vadd.f32 %v1287_v8, %v1273_v3  ;;  %v1288_v25 = vadd.f32 %v1286_v21, %v1272_v32 }
 0x1e8   : > { %v1302_v62 = vmul.f32 %v1297_v7, %v1292_v16  ;;  %v1303_v12 = vmul.f32 %v1301_v13, %v1292_v16  ;;  %v3800_v7 = vmov 23  }
 0x1ea   : > { %v1304_v35 = vadd.f32 %v1302_v62, %v1288_v25  ;;  %v1305_v34 = vadd.f32 %v1303_v12, %v1289_v42  ;;  %v2120_v25 = vld [vmem:[%s3606_s8] sm:$0xff]  ;;  %v3795_v42 = vmov 18   ;;  %v3797_v12 = vmov 20  }
 0x1eb   : > { %v3798_v62 = vmov 21  }
 0x1ec   : > { %v1308_v57 = vpop.permute.xlu1 %1307 }
 0x1ed   : > { %v1318_v63 = vmul.f32 %v1313_v28, %v1308_v57  ;;  %v1319_v31 = vmul.f32 %v1317_v14, %v1308_v57  ;;  %v3807_v14 = vmov 2   ;;  %v3810_v28 = vmov 7  }
 0x1ef   : > { %v1320_v4 = vadd.f32 %v1318_v63, %v1304_v35  ;;  %v1321_v32 = vadd.f32 %v1319_v31, %v1305_v34  ;;  %v3303_v35 = vpop.permute.xlu0 %1485 }
 0x1f1   : > { %v1336_v59 = vadd.f32 %v1334_v47, %v1320_v4  ;;  %v1337_v3 = vadd.f32 %v1335_v37, %v1321_v32  ;;  %v1347_v57 = vpop.permute.xlu1 %1346 }
 0x1f3   : > { %v1338_v8 = vmul.f32 0.1, %v1336_v59  ;;  %v1339_v13 = vmul.f32 0.1, %v1337_v3  ;;  %v3307_v63 = vpop.permute.xlu0 %1501 }
 0x1f5   : > { %v3219_v16 = vmax.f32 %v1336_v59, %v1338_v8  ;;  %v3221_v21 = vmax.f32 %v1337_v3, %v1339_v13  ;;  %v1358_v34 = vpop.permute.xlu1 %1357 }
 0x1f7   : > { %1351 = vrot.lane.b32.xlu0 %v3221_v21, %s2148_s22  ;;  %1349 = vrot.lane.b32.xlu1 %v3219_v16, %s2148_s22  ;;  %v3315_v47 = vpop.permute.xlu0 %1517  ;;  %s3820_s22 = smov 98  }
 0x1fa   : > { %v3309_v31 = vpop.permute.xlu1 %1543 }
 0x1fb   : > { %1366 = vrot.lane.b32.xlu0 %v3219_v16, %s2149_s23  ;;  %1368 = vrot.lane.b32.xlu1 %v3221_v21, %s2149_s23  ;;  %s3801_s23 = smov 16   ;;  %v3321_v4 = vpop.permute.xlu0 %1533 }
 0x1ff   : > { %1552 = vrot.lane.b32.xlu0 %v3221_v21, %s2150_s24  ;;  %1382 = vrot.lane.b32.xlu1 %v3219_v16, %s2151_s27  ;;  %v3317_v37 = vpop.permute.xlu1 %1557  ;;  %v3329_v59 = vpop.permute.xlu0 %1573 }
 0x203   : > { %1566 = vrot.lane.b32.xlu0 %v3219_v16, %s2152_s28  ;;  %1384 = vrot.lane.b32.xlu1 %v3221_v21, %s2151_s27  ;;  %s3803_s27 = smov 95  }
 0x204   : > { %v3323_v32 = vpop.permute.xlu1 %1589 }
 0x207   : > { %1621 = vperm.xlu0 %2102, %v2120_v25   ;;  %1398 = vrot.lane.b32.xlu1 %v3219_v16, %s2153_s29 }
 0x209   : > { %v3331_v3 = vpop.permute.xlu1 %1605 }
 0x20b   : > { %2103 = vset.pattern.permute.xlu0 %v3795_v42  ;;  %1400 = vrot.lane.b32.xlu1 %v3221_v21, %s2153_s29  ;;  %s3804_s29 = smov 15  }
 0x20c   : > { %1637 = vperm.xlu0 %2103, %v2120_v25  }
 0x20f   : > { %1414 = vrot.lane.b32.xlu1 %v3219_v16, %s2155_s30 }
 0x210   : > { %2104 = vset.pattern.permute.xlu0 %v3796_v60 }
 0x211   : > { %1653 = vperm.xlu0 %2104, %v2120_v25  }
 0x213   : > { %1416 = vrot.lane.b32.xlu1 %v3221_v21, %s2155_s30  ;;  %s3805_s30 = smov 94  }
 0x215   : > { %2105 = vset.pattern.permute.xlu0 %v3797_v12 }
 0x216   : > { %1669 = vperm.xlu0 %2105, %v2120_v25  }
 0x217   : > { %1430 = vrot.lane.b32.xlu1 %v3219_v16, %s2158_s14 }
 0x21a   : > { %2106 = vset.pattern.permute.xlu0 %v3798_v62 }
 0x21b   : > { %1685 = vperm.xlu0 %2106, %v2120_v25   ;;  %1432 = vrot.lane.b32.xlu1 %v3221_v21, %s2158_s14 }
 0x21f   : > { %2107 = vset.pattern.permute.xlu0 %v3799_v54  ;;  %1446 = vrot.lane.b32.xlu1 %v3219_v16, %s2161_s15  ;;  %v3815_v54 = vld [vmem:[#allocation25_spill] sm:$0xff] }
 0x220   : > { %1701 = vperm.xlu0 %2107, %v2120_v25  }
 0x223   : > { %1448 = vrot.lane.b32.xlu1 %v3221_v21, %s2161_s15 }
 0x224   : > { %2108 = vset.pattern.permute.xlu0 %v3800_v7 }
 0x225   : > { %1717 = vperm.xlu0 %2108, %v2120_v25  }
 0x227   : > { %1462 = vrot.lane.b32.xlu1 %v3219_v16, %s3801_s23 }
 0x229   : > { %2109 = vset.pattern.permute.xlu0 %v3802_v20 }
 0x22a   : > { %1733 = vperm.xlu0 %2109, %v2120_v25  }
 0x22b   : > { %1464 = vrot.lane.b32.xlu1 %v3221_v21, %s3801_s23  ;;  %s3821_s23 = smov 97  }
 0x22e   : > { %1710 = vrot.lane.b32.xlu0 %v3219_v16, %s3803_s27 }
 0x22f   : > { %1478 = vrot.lane.b32.xlu1 %v3219_v16, %s3804_s29  ;;  %2110 = vset.pattern.permute.xlu0 %v3750_v41  ;;  %v3809_v41 = vmov 5  }
 0x232   : > { %1726 = vrot.lane.b32.xlu0 %v3219_v16, %s3805_s30 }
 0x233   : > { %1480 = vrot.lane.b32.xlu1 %v3221_v21, %s3804_s29  ;;  %s3822_s29 = smov 96  }
 0x236   : > { %1755 = vperm.xlu0 %2110, %v3281_v36  }
 0x237   : > { %1494 = vrot.lane.b32.xlu1 %v3219_v16, %s3806_s19 }
 0x23a   : > { %2113 = vset.pattern.permute.xlu0 %v3807_v14 }
 0x23b   : > { %1496 = vrot.lane.b32.xlu1 %v3221_v21, %s3806_s19  ;;  %1787 = vperm.xlu0 %2113, %v3281_v36  }
 0x23f   : > { %1510 = vrot.lane.b32.xlu1 %v3219_v16, %s3808_s18  ;;  %2116 = vset.pattern.permute.xlu0 %v3809_v41 }
 0x240   : > { %1835 = vperm.xlu0 %2116, %v3281_v36  }
 0x243   : > { %1512 = vrot.lane.b32.xlu1 %v3221_v21, %s3808_s18 }
 0x244   : > { %2119 = vset.pattern.permute.xlu0 %v3810_v28 }
 0x247   : > { %1526 = vrot.lane.b32.xlu1 %v3219_v16, %s3811_s20 }
 0x24b   : > { %1528 = vrot.lane.b32.xlu1 %v3221_v21, %s3811_s20 }
 0x24f   : > { %1550 = vrot.lane.b32.xlu1 %v3219_v16, %s2150_s24  ;;  %s3813_s24 = smov 113  }
 0x253   : > { %1568 = vrot.lane.b32.xlu1 %v3221_v21, %s2152_s28  ;;  %s3814_s28 = smov 112  }
 0x257   : > { %1582 = vrot.lane.b32.xlu1 %v3219_v16, %s3812_s17 }
 0x25b   : > { %1584 = vrot.lane.b32.xlu1 %v3221_v21, %s3812_s17 }
 0x25f   : > { %1598 = vrot.lane.b32.xlu1 %v3219_v16, %s3813_s24 }
 0x263   : > { %1600 = vrot.lane.b32.xlu1 %v3221_v21, %s3813_s24 }
 0x267   : > { %1614 = vrot.lane.b32.xlu1 %v3219_v16, %s3814_s28 }
 0x269   : > { %v1352_v8 = vpop.permute.xlu0 %1351  ;;  %v1350_v13 = vpop.permute.xlu1 %1349 }
 0x26a   : > { %v1353_v25 = vsel %vm593_vm0, %v1350_v13, %v1352_v8  ;;  %v1354_v42 = vsel %vm593_vm0, %v1352_v8, %v1350_v13  ;;  %vm3837_vm0 = vcmp.lt.s32.totalorder %v2611_v10, 127 }
 0x26b   : > { %v1360_v60 = vmul.f32 %v1358_v34, %v1354_v42  ;;  %v1361_v12 = vmul.f32 %v1358_v34, %v1353_v25  ;;  %1616 = vrot.lane.b32.xlu1 %v3221_v21, %s3814_s28  ;;  %v3818_v42 = vld [vmem:[#allocation27_spill] sm:$0xff] }
 0x26d   : > { %v1362_v62 = vmul.f32 %v1360_v60, %v2647_v18  ;;  %v1363_v7 = vmul.f32 %v1361_v12, %v3815_v54  ;;  %v1367_v20 = vpop.permute.xlu0 %1366  ;;  %v1369_v14 = vpop.permute.xlu1 %1368  ;;  %v3817_v18 = vld [vmem:[#allocation26_spill] sm:$0xff] }
 0x26e   : > { %v1370_v41 = vsel %vm619_vm1, %v1367_v20, %v1369_v14  ;;  %v1371_v43 = vsel %vm619_vm1, %v1369_v14, %v1367_v20  ;;  %vm3838_vm1 = vmmov %vm3837_vm0 }
 0x26f   : > { %v1376_v33 = vmul.f32 %v3169_v1, %v1371_v43  ;;  %v1377_v8 = vmul.f32 %v3169_v1, %v1370_v41  ;;  %1630 = vrot.lane.b32.xlu1 %v3219_v16, %s3816_s21  ;;  %v1364_v34 = vadd.f32 %v1362_v62, %v1347_v57  ;;  %v1365_v13 = vadd.f32 %v1363_v7, %v1347_v57 }
 0x271   : > { %v1378_v25 = vmul.f32 %v1376_v33, %v3817_v18  ;;  %v1379_v60 = vmul.f32 %v1377_v8, %v3818_v42  ;;  %v1383_v12 = vpop.permute.xlu1 %1382 }
 0x273   : > { %v1380_v54 = vadd.f32 %v1378_v25, %v1364_v34  ;;  %v1381_v29 = vadd.f32 %v1379_v60, %v1365_v13  ;;  %1632 = vrot.lane.b32.xlu1 %v3221_v21, %s3816_s21 }
 0x275   : > { %v1385_v20 = vpop.permute.xlu1 %1384 }
 0x276   : > { %v1386_v43 = vsel %vm644_vm2, %v1383_v12, %v1385_v20  ;;  %v1387_v1 = vsel %vm644_vm2, %v1385_v20, %v1383_v12  ;;  %vm3839_vm2 = vcmp.lt.s32.totalorder %v2611_v10, 126 }
 0x277   : > { %v1392_v62 = vmul.f32 %v3191_v48, %v1387_v1  ;;  %v1393_v57 = vmul.f32 %v3191_v48, %v1386_v43  ;;  %1646 = vrot.lane.b32.xlu1 %v3219_v16, %s3819_s16 }
 0x279   : > { %v1394_v33 = vmul.f32 %v1392_v62, %v2694_v23  ;;  %v1395_v7 = vmul.f32 %v1393_v57, %v2698_v15  ;;  %v1399_v14 = vpop.permute.xlu1 %1398 }
 0x27b   : > { %v1396_v41 = vadd.f32 %v1394_v33, %v1380_v54  ;;  %v1397_v8 = vadd.f32 %v1395_v7, %v1381_v29  ;;  %1648 = vrot.lane.b32.xlu1 %v3221_v21, %s3819_s16 }
 0x27d   : > { %v1401_v34 = vpop.permute.xlu1 %1400 }
 0x27e   : > { %v1402_v13 = vsel %vm669_vm3, %v1399_v14, %v1401_v34  ;;  %v1403_v48 = vsel %vm669_vm3, %v1401_v34, %v1399_v14  ;;  %vm3840_vm3 = vmmov %vm3839_vm2 }
 0x27f   : > { %v1408_v18 = vmul.f32 %v3193_v27, %v1403_v48  ;;  %v1409_v25 = vmul.f32 %v3193_v27, %v1402_v13  ;;  %1662 = vrot.lane.b32.xlu1 %v3219_v16, %s3820_s22 }
 0x281   : > { %v1410_v23 = vmul.f32 %v1408_v18, %v2718_v38  ;;  %v1411_v29 = vmul.f32 %v1409_v25, %v2722_v53  ;;  %v1415_v15 = vpop.permute.xlu1 %1414 }
 0x283   : > { %v1412_v42 = vadd.f32 %v1410_v23, %v1396_v41  ;;  %v1413_v60 = vadd.f32 %v1411_v29, %v1397_v8  ;;  %1664 = vrot.lane.b32.xlu1 %v3221_v21, %s3820_s22 }
 0x285   : > { %v1417_v12 = vpop.permute.xlu1 %1416 }
 0x286   : > { %v1418_v54 = vsel %vm694_vm4, %v1415_v15, %v1417_v12  ;;  %v1419_v27 = vsel %vm694_vm4, %v1417_v12, %v1415_v15  ;;  %vm3841_vm4 = vcmp.lt.s32.totalorder %v2611_v10, 114 }
 0x287   : > { %v1424_v20 = vmul.f32 %v3199_v19, %v1419_v27  ;;  %v1425_v43 = vmul.f32 %v3199_v19, %v1418_v54  ;;  %1678 = vrot.lane.b32.xlu1 %v3219_v16, %s3821_s23  ;;  %v3823_v27 = vld [vmem:[#allocation28_spill] sm:$0xff] }
 0x289   : > { %v1426_v38 = vmul.f32 %v1424_v20, %v2742_v2  ;;  %v1427_v53 = vmul.f32 %v1425_v43, %v2746_v5  ;;  %v1431_v1 = vpop.permute.xlu1 %1430  ;;  %v3824_v43 = vld [vmem:[#allocation29_spill] sm:$0xff] }
 0x28b   : > { %v1428_v62 = vadd.f32 %v1426_v38, %v1412_v42  ;;  %v1429_v57 = vadd.f32 %v1427_v53, %v1413_v60  ;;  %1680 = vrot.lane.b32.xlu1 %v3221_v21, %s3821_s23  ;;  %v1747_v60 = vld [vmem:[%s3609_s11] sm:$0xff] }
 0x28d   : > { %v1433_v33 = vpop.permute.xlu1 %1432 }
 0x28e   : > { %v1434_v7 = vsel %vm719_vm5, %v1431_v1, %v1433_v33  ;;  %v1435_v19 = vsel %vm719_vm5, %v1433_v33, %v1431_v1  ;;  %vm3842_vm5 = vmmov %vm3841_vm4 }
 0x28f   : > { %v1440_v14 = vmul.f32 %v3205_v46, %v1435_v19  ;;  %v1441_v41 = vmul.f32 %v3205_v46, %v1434_v7  ;;  %1694 = vrot.lane.b32.xlu1 %v3219_v16, %s3822_s29 }
 0x291   : > { %v1442_v2 = vmul.f32 %v1440_v14, %v2767_v49  ;;  %v1443_v5 = vmul.f32 %v1441_v41, %v2771_v61  ;;  %v1447_v8 = vpop.permute.xlu1 %1446  ;;  %v3826_v41 = vmov 3  }
 0x293   : > { %v1444_v34 = vadd.f32 %v1442_v2, %v1428_v62  ;;  %v1445_v13 = vadd.f32 %v1443_v5, %v1429_v57  ;;  %1696 = vrot.lane.b32.xlu1 %v3221_v21, %s3822_s29  ;;  %v3825_v57 = vmov 1   ;;  %v3827_v2 = vld [vmem:[#allocation30_spill] sm:$0xff] }
 0x295   : > { %v1449_v48 = vpop.permute.xlu1 %1448 }
 0x296   : > { %v1450_v18 = vsel %vm744_vm6, %v1447_v8, %v1449_v48  ;;  %v1451_v46 = vsel %vm744_vm6, %v1449_v48, %v1447_v8  ;;  %v3828_v8 = vld [vmem:[#allocation31_spill] sm:$0xff]  ;;  %vm3846_vm6 = vcmp.lt.s32.totalorder %v2611_v10, 112 }
 0x297   : > { %v1456_v25 = vmul.f32 %v3211_v9, %v1451_v46  ;;  %v1457_v23 = vmul.f32 %v3211_v9, %v1450_v18  ;;  %1712 = vrot.lane.b32.xlu1 %v3221_v21, %s3803_s27  ;;  %v3829_v46 = vmov 4   ;;  %s1994_s27 = sshll.u32 %s3871_s26, 4 }
 0x298   : > { %s448_s18 = scalar_lea.vmem %s3610_s12, %s1994_s27  ;;  %s453_s24 = scalar_lea.vmem %s3611_s13, %s1994_s27 }
 0x299   : > { %v1458_v49 = vmul.f32 %v1456_v25, %v2792_v50  ;;  %v1459_v61 = vmul.f32 %v1457_v23, %v2796_v30  ;;  %v1463_v29 = vpop.permute.xlu1 %1462 }
 0x29b   : > { %v1460_v15 = vadd.f32 %v1458_v49, %v1444_v34  ;;  %v1461_v42 = vadd.f32 %v1459_v61, %v1445_v13  ;;  %1728 = vrot.lane.b32.xlu1 %v3221_v21, %s3805_s30 }
 0x29d   : > { %v1465_v12 = vpop.permute.xlu1 %1464 }
 0x29e   : > { %v1466_v9 = vsel %vm769_vm7, %v1463_v29, %v1465_v12  ;;  %v1467_v54 = vsel %vm769_vm7, %v1465_v12, %v1463_v29  ;;  %v3830_v29 = vld [vmem:[#allocation32_spill] sm:$0xff]  ;;  %vm3847_vm7 = vmmov %vm3846_vm6 }
 0x29f   : > { %v1472_v50 = vmul.f32 %v3297_v22, %v1467_v54  ;;  %v1473_v30 = vmul.f32 %v3297_v22, %v1466_v9  ;;  %1750 = vperm.xlu1 %2111, %v1747_v60   ;;  %v3832_v9 = vmov 6  }
 0x2a1   : > { %v1474_v20 = vmul.f32 %v1472_v50, %v3823_v27  ;;  %v1475_v38 = vmul.f32 %v1473_v30, %v3824_v43  ;;  %v1479_v53 = vpop.permute.xlu1 %1478 }
 0x2a3   : > { %v1476_v1 = vadd.f32 %v1474_v20, %v1460_v15  ;;  %v1477_v62 = vadd.f32 %v1475_v38, %v1461_v42  ;;  %2112 = vset.pattern.permute.xlu1 %v3825_v57  ;;  %v3831_v42 = vld [vmem:[#allocation33_spill] sm:$0xff]  ;;  %v3833_v38 = vld [vmem:[#allocation34_spill] sm:$0xff] }
 0x2a4   : > { %1771 = vperm.xlu1 %2112, %v3281_v36  }
 0x2a5   : > { %v1481_v33 = vpop.permute.xlu1 %1480 }
 0x2a6   : > { %v1482_v7 = vsel %vm794_vm8, %v1479_v53, %v1481_v33  ;;  %v1483_v19 = vsel %vm794_vm8, %v1481_v33, %v1479_v53  ;;  %vm3848_vm8 = vcmp.lt.s32.totalorder %v2611_v10, 111 }
 0x2a7   : > { %v1488_v22 = vmul.f32 %v3303_v35, %v1483_v19  ;;  %v1489_v14 = vmul.f32 %v3303_v35, %v1482_v7 }
 0x2a8   : > { %2114 = vset.pattern.permute.xlu1 %v3826_v41 }
 0x2a9   : > { %v1490_v5 = vmul.f32 %v1488_v22, %v3827_v2  ;;  %v1491_v34 = vmul.f32 %v1489_v14, %v3828_v8  ;;  %1803 = vperm.xlu1 %2114, %v3281_v36   ;;  %v1495_v13 = vpop.permute.xlu1 %1494  ;;  %v1553_v2 = vpop.permute.xlu0 %1552 }
 0x2ab   : > { %v1492_v48 = vadd.f32 %v1490_v5, %v1476_v1  ;;  %v1493_v18 = vadd.f32 %v1491_v34, %v1477_v62  ;;  %v3834_v1 = vld [vmem:[#allocation35_spill] sm:$0xff] }
 0x2ad   : > { %2115 = vset.pattern.permute.xlu1 %v3829_v46  ;;  %v1497_v25 = vpop.permute.xlu1 %1496  ;;  %v1567_v34 = vpop.permute.xlu0 %1566 }
 0x2ae   : > { %v1498_v23 = vsel %vm819_vm9, %v1495_v13, %v1497_v25  ;;  %v1499_v35 = vsel %vm819_vm9, %v1497_v25, %v1495_v13  ;;  %1819 = vperm.xlu1 %2115, %v3281_v36   ;;  %vm3849_vm9 = vmmov %vm3848_vm8 }
 0x2af   : > { %v1504_v49 = vmul.f32 %v3307_v63, %v1499_v35  ;;  %v1505_v61 = vmul.f32 %v3307_v63, %v1498_v23 }
 0x2b1   : > { %v1506_v15 = vmul.f32 %v1504_v49, %v3830_v29  ;;  %v1507_v60 = vmul.f32 %v1505_v61, %v3831_v42  ;;  %v1511_v12 = vpop.permute.xlu1 %1510  ;;  %v1622_v13 = vpop.permute.xlu0 %1621  ;;  %v3835_v42 = vld [vmem:[#allocation36_spill] sm:$0xff] }
 0x2b2   : > { %2117 = vset.pattern.permute.xlu1 %v3832_v9 }
 0x2b3   : > { %v1508_v54 = vadd.f32 %v1506_v15, %v1492_v48  ;;  %v1509_v50 = vadd.f32 %v1507_v60, %v1493_v18  ;;  %1851 = vperm.xlu1 %2117, %v3281_v36  }
 0x2b5   : > { %v1513_v30 = vpop.permute.xlu1 %1512  ;;  %v1638_v48 = vpop.permute.xlu0 %1637 }
 0x2b6   : > { %v1514_v27 = vsel %vm844_vm10, %v1511_v12, %v1513_v30  ;;  %v1515_v20 = vsel %vm844_vm10, %v1513_v30, %v1511_v12  ;;  %v3836_v12 = vld [vmem:[#allocation37_spill] sm:$0xff]  ;;  %vm3851_vm10 = vcmp.lt.s32.totalorder %v2611_v10, 110 }
 0x2b7   : > { %v1520_v63 = vmul.f32 %v3315_v47, %v1515_v20  ;;  %v1521_v43 = vmul.f32 %v3315_v47, %v1514_v27  ;;  %2118 = vset.pattern.permute.xlu1 %v3810_v28 }
 0x2b8   : > { %1867 = vperm.xlu1 %2118, %v3281_v36  }
 0x2b9   : > { %v1522_v53 = vmul.f32 %v1520_v63, %v3833_v38  ;;  %v1523_v62 = vmul.f32 %v1521_v43, %v3834_v1  ;;  %v1527_v57 = vpop.permute.xlu1 %1526  ;;  %v3460_v46 = vpop.permute.xlu0 %1653 }
 0x2bb   : > { %v1524_v33 = vadd.f32 %v1522_v53, %v1508_v54  ;;  %v1525_v7 = vadd.f32 %v1523_v62, %v1509_v50  ;;  %v1546_v62 = vmul.f32 %v3309_v31, %v3219_v16  ;;  %v3843_v16 = vld [vmem:[#allocation23_spill] sm:$0xff] }
 0x2bd   : > { %v1529_v19 = vpop.permute.xlu1 %1528  ;;  %v3468_v29 = vpop.permute.xlu0 %1669 }
 0x2be   : > { %v1530_v25 = vsel %vm869_vm11, %v1527_v57, %v1529_v19  ;;  %v1531_v23 = vsel %vm869_vm11, %v1529_v19, %v1527_v57  ;;  %v1547_v57 = vmul.f32 %v3309_v31, %v3221_v21  ;;  %vm3852_vm11 = vmmov %vm3851_vm10 }
 0x2bf   : > { %v1536_v49 = vmul.f32 %v3321_v4, %v1531_v23  ;;  %v1537_v61 = vmul.f32 %v3321_v4, %v1530_v25 }
 0x2c1   : > { %v1551_v22 = vpop.permute.xlu1 %1550  ;;  %v1538_v60 = vmul.f32 %v1536_v49, %v3835_v42  ;;  %v1539_v9 = vmul.f32 %v1537_v61, %v3836_v12  ;;  %v3476_v27 = vpop.permute.xlu0 %1685  ;;  %v3845_v61 = vld [vmem:[#allocation38_spill] sm:$0xff] }
 0x2c2   : > { %v1554_v50 = vsel %vm3837_vm0, %v1551_v22, %v1553_v2  ;;  %v1555_v30 = vsel %vm3838_vm1, %v1553_v2, %v1551_v22 }
 0x2c3   : > { %v1540_v20 = vadd.f32 %v1538_v60, %v1524_v33  ;;  %v1541_v63 = vadd.f32 %v1539_v9, %v1525_v7  ;;  %v1560_v38 = vmul.f32 %v3317_v37, %v1554_v50  ;;  %v1561_v53 = vmul.f32 %v3317_v37, %v1555_v30 }
 0x2c5   : > { %v1569_v14 = vpop.permute.xlu1 %1568  ;;  %v1548_v2 = vadd.f32 %v1546_v62, %v1540_v20  ;;  %v3494_v37 = vpop.permute.xlu0 %1701  ;;  %v1563_v25 = vmul.f32 %v1561_v53, %v3843_v16 }
 0x2c6   : > { %v1570_v4 = vsel %vm3839_vm2, %v1567_v34, %v1569_v14  ;;  %v1571_v43 = vsel %vm3840_vm3, %v1569_v14, %v1567_v34  ;;  %v1549_v14 = vadd.f32 %v1547_v57, %v1541_v63  ;;  %v1562_v34 = vmul.f32 %v1560_v38, %v2947_v58 }
 0x2c7   : > { %v1576_v33 = vmul.f32 %v3329_v59, %v1570_v4  ;;  %v1577_v7 = vmul.f32 %v3329_v59, %v1571_v43 }
 0x2c9   : > { %v1583_v41 = vpop.permute.xlu1 %1582  ;;  %v1579_v42 = vmul.f32 %v1577_v7, %v3845_v61 }
 0x2cd   : > { %v1585_v5 = vpop.permute.xlu1 %1584 }
 0x2ce   : > { %v1586_v19 = vsel %vm3841_vm4, %v1583_v41, %v1585_v5  ;;  %v1587_v22 = vsel %vm3842_vm5, %v1585_v5, %v1583_v41  ;;  %v3844_v41 = vld [vmem:[#allocation9_spill] sm:$0xff] }
 0x2cf   : > { %v1592_v23 = vmul.f32 %v3323_v32, %v1586_v19  ;;  %v1593_v49 = vmul.f32 %v3323_v32, %v1587_v22  ;;  %v1578_v5 = vmul.f32 %v1576_v33, %v3844_v41 }
 0x2d1   : > { %v1599_v8 = vpop.permute.xlu1 %1598  ;;  %v1594_v30 = vmul.f32 %v1592_v23, %v2986_v52  ;;  %v1595_v32 = vmul.f32 %v1593_v49, %v2990_v6 }
 0x2d5   : > { %v1601_v47 = vpop.permute.xlu1 %1600 }
 0x2d6   : > { %v1602_v21 = vsel %vm977_vm15, %v1599_v8, %v1601_v47  ;;  %v1603_v31 = vsel %vm977_vm15, %v1601_v47, %v1599_v8  ;;  %v1564_v8 = vadd.f32 %v1562_v34, %v1548_v2  ;;  %v1565_v47 = vadd.f32 %v1563_v25, %v1549_v14 }
 0x2d7   : > { %v1608_v60 = vmul.f32 %v3331_v3, %v1602_v21  ;;  %v1609_v58 = vmul.f32 %v3331_v3, %v1603_v31  ;;  %v1718_v3 = vpop.permute.xlu0 %1717  ;;  %vm3853_vm15 = vcmp.lt.s32.totalorder %v2611_v10, 98 }
 0x2d8   : > { %v1580_v38 = vadd.f32 %v1578_v5, %v1564_v8  ;;  %v1581_v53 = vadd.f32 %v1579_v42, %v1565_v47  ;;  %vm3854_vm0 = vmmov %vm3853_vm15 }
 0x2d9   : > { %v1615_v28 = vpop.permute.xlu1 %1614 }
 0x2da   : > { %v1596_v19 = vadd.f32 %v1594_v30, %v1580_v38 }
 0x2db   : > { %v1734_v2 = vpop.permute.xlu0 %1733 }
 0x2dd   : > { %v1617_v36 = vpop.permute.xlu1 %1616 }
 0x2de   : > { %v1618_v12 = vsel %vm3846_vm6, %v1615_v28, %v1617_v36  ;;  %v1619_v9 = vsel %vm3847_vm7, %v1617_v36, %v1615_v28  ;;  %v1610_v28 = vmul.f32 %v1608_v60, %v2995_v39  ;;  %v3850_v36 = vld [vmem:[#allocation10_spill] sm:$0xff] }
 0x2df   : > { %v1624_v4 = vmul.f32 %v1622_v13, %v1618_v12  ;;  %v1625_v43 = vmul.f32 %v1622_v13, %v1619_v9  ;;  %v1611_v62 = vmul.f32 %v1609_v58, %v3850_v36  ;;  %v3860_v36 = vld [vmem:[#allocation12_spill] sm:$0xff] }
 0x2e0   : > { %v1612_v34 = vadd.f32 %v1610_v28, %v1596_v19  ;;  %v3859_v28 = vld [vmem:[#allocation11_spill] sm:$0xff] }
 0x2e1   : > { %v1631_v18 = vpop.permute.xlu1 %1630  ;;  %v1627_v13 = vmul.f32 %v1625_v43, %v3018_v56 }
 0x2e5   : > { %v1633_v35 = vpop.permute.xlu1 %1632 }
 0x2e6   : > { %v1634_v20 = vsel %vm3848_vm8, %v1631_v18, %v1633_v35  ;;  %v1635_v63 = vsel %vm3849_vm9, %v1633_v35, %v1631_v18  ;;  %v1597_v18 = vadd.f32 %v1595_v32, %v1581_v53  ;;  %v1626_v35 = vmul.f32 %v1624_v4, %v3014_v0  ;;  %v3857_v32 = vld [vmem:[#allocation24_spill] sm:$0xff] }
 0x2e7   : > { %v1640_v57 = vmul.f32 %v1638_v48, %v1634_v20  ;;  %v1641_v33 = vmul.f32 %v1638_v48, %v1635_v63  ;;  %v3858_v63 = vld [vmem:[#allocation15_spill] sm:$0xff] }
 0x2e8   : > { %v1628_v31 = vadd.f32 %v1626_v35, %v1612_v34 }
 0x2e9   : > { %v1647_v15 = vpop.permute.xlu1 %1646  ;;  %v1643_v16 = vmul.f32 %v1641_v33, %v3039_v44 }
 0x2ed   : > { %v1649_v54 = vpop.permute.xlu1 %1648 }
 0x2ee   : > { %v1650_v6 = vsel %vm3851_vm10, %v1647_v15, %v1649_v54  ;;  %v1651_v52 = vsel %vm3852_vm11, %v1649_v54, %v1647_v15  ;;  %v1613_v15 = vadd.f32 %v1611_v62, %v1597_v18  ;;  %v1642_v54 = vmul.f32 %v1640_v57, %v3035_v55 }
 0x2ef   : > { %v1656_v48 = vmul.f32 %v3460_v46, %v1650_v6  ;;  %v1657_v14 = vmul.f32 %v3460_v46, %v1651_v52 }
 0x2f0   : > { %v1629_v46 = vadd.f32 %v1627_v13, %v1613_v15  ;;  %v1644_v55 = vadd.f32 %v1642_v54, %v1628_v31  ;;  %v3861_v13 = vld [vmem:[#allocation13_spill] sm:$0xff] }
 0x2f1   : > { %v1663_v1 = vpop.permute.xlu1 %1662  ;;  %v1659_v23 = vmul.f32 %v1657_v14, %v3060_v40 }
 0x2f2   : > { %v1645_v49 = vadd.f32 %v1643_v16, %v1629_v46  ;;  %v3864_v46 = vld [vmem:[#allocation3_spill] sm:$0xff] }
 0x2f4   : > { %v1661_v9 = vadd.f32 %v1659_v23, %v1645_v49 }
 0x2f5   : > { %v1665_v59 = vpop.permute.xlu1 %1664 }
 0x2f6   : > { %v1666_v39 = vsel %vm3853_vm15, %v1663_v1, %v1665_v59  ;;  %v1667_v22 = vsel %vm3854_vm0, %v1665_v59, %v1663_v1  ;;  %v1658_v59 = vmul.f32 %v1656_v48, %v3056_v11  ;;  %v1711_v11 = vpop.permute.xlu0 %1710 }
 0x2f7   : > { %v1672_v56 = vmul.f32 %v3468_v29, %v1666_v39  ;;  %v1673_v25 = vmul.f32 %v3468_v29, %v1667_v22  ;;  %v3862_v22 = vld [vmem:[#allocation14_spill] sm:$0xff] }
 0x2f8   : > { %v1660_v12 = vadd.f32 %v1658_v59, %v1644_v55  ;;  %v3865_v55 = vld [vmem:[#allocation5_spill] sm:$0xff] }
 0x2f9   : > { %v1679_v50 = vpop.permute.xlu1 %1678  ;;  %v1674_v29 = vmul.f32 %v1672_v56, %v3077_v51  ;;  %v1675_v61 = vmul.f32 %v1673_v25, %v3093_v45 }
 0x2fa   : > { %v1727_v38 = vpop.permute.xlu0 %1726 }
 0x2fb   : > { %v1676_v47 = vadd.f32 %v1674_v29, %v1660_v12  ;;  %v1677_v45 = vadd.f32 %v1675_v61, %v1661_v9  ;;  %v3866_v9 = vld [vmem:[#allocation7_spill] sm:$0xff] }
 0x2fd   : > { %v1681_v7 = vpop.permute.xlu1 %1680 }
 0x2fe   : > { %v1682_v21 = vsel %vm1102_vm14, %v1679_v50, %v1681_v7  ;;  %v1683_v1 = vsel %vm1102_vm14, %v1681_v7, %v1679_v50  ;;  %vm3855_vm14 = vcmp.lt.s32.totalorder %v2611_v10, 95 }
 0x2ff   : > { %v1688_v44 = vmul.f32 %v3476_v27, %v1682_v21  ;;  %v1689_v41 = vmul.f32 %v3476_v27, %v1683_v1  ;;  %vm3856_vm1 = vmmov %vm3855_vm14  ;;  %v1756_v21 = vpop.permute.xlu0 %1755 }
 0x301   : > { %v1695_v0 = vpop.permute.xlu1 %1694  ;;  %v1690_v27 = vmul.f32 %v1688_v44, %v3110_v24  ;;  %v1691_v8 = vmul.f32 %v1689_v41, %v3125_v17 }
 0x303   : > { %v1692_v53 = vadd.f32 %v1690_v27, %v1676_v47  ;;  %v1693_v24 = vadd.f32 %v1691_v8, %v1677_v45 }
 0x305   : > { %v1697_v5 = vpop.permute.xlu1 %1696 }
 0x306   : > { %v1698_v42 = vsel %vm1127_vm12, %v1695_v0, %v1697_v5  ;;  %v1699_v60 = vsel %vm1127_vm12, %v1697_v5, %v1695_v0 }
 0x307   : > { %v1704_v40 = vmul.f32 %v3494_v37, %v1698_v42  ;;  %v1705_v58 = vmul.f32 %v3494_v37, %v1699_v60 }
 0x309   : > { %v1713_v51 = vpop.permute.xlu1 %1712  ;;  %v1706_v20 = vmul.f32 %v1704_v40, %v3857_v32  ;;  %v1707_v4 = vmul.f32 %v1705_v58, %v3858_v63  ;;  %v1788_v40 = vpop.permute.xlu0 %1787  ;;  %v3867_v63 = vld [vmem:[#allocation4_spill] sm:$0xff] }
 0x30a   : > { %v1714_v50 = vsel %vm3855_vm14, %v1711_v11, %v1713_v51  ;;  %v1715_v30 = vsel %vm3856_vm1, %v1713_v51, %v1711_v11 }
 0x30b   : > { %v1720_v37 = vmul.f32 %v1718_v3, %v1714_v50  ;;  %v1721_v43 = vmul.f32 %v1718_v3, %v1715_v30  ;;  %v1708_v52 = vadd.f32 %v1706_v20, %v1692_v53  ;;  %v1709_v7 = vadd.f32 %v1707_v4, %v1693_v24 }
 0x30d   : > { %v1722_v17 = vmul.f32 %v1720_v37, %v3859_v28  ;;  %v1723_v62 = vmul.f32 %v1721_v43, %v3860_v36  ;;  %v1729_v57 = vpop.permute.xlu1 %1728 }
 0x30e   : > { %v1730_v33 = vsel %vm1177_vm13, %v1727_v38, %v1729_v57  ;;  %v1731_v6 = vsel %vm1177_vm13, %v1729_v57, %v1727_v38 }
 0x30f   : > { %v1736_v19 = vmul.f32 %v1734_v2, %v1730_v33  ;;  %v1737_v3 = vmul.f32 %v1734_v2, %v1731_v6  ;;  %v1724_v18 = vadd.f32 %v1722_v17, %v1708_v52  ;;  %v1725_v35 = vadd.f32 %v1723_v62, %v1709_v7  ;;  %v3863_v2 = vld [vmem:[#allocation2_spill] sm:$0xff]  ;;  %v1836_v17 = vpop.permute.xlu0 %1835 }
 0x310   : > { %v3868_v6 = vld [vmem:[#allocation6_spill] sm:$0xff] }
 0x311   : > { %v1738_v39 = vmul.f32 %v3861_v13, %v1736_v19  ;;  %v1739_v48 = vmul.f32 %v3862_v22, %v1737_v3  ;;  %v3869_v13 = vld [vmem:[#allocation8_spill] sm:$0xff] }
 0x313   : > { %v1740_v14 = vadd.f32 %v1738_v39, %v1724_v18  ;;  %v1741_v34 = vadd.f32 %v1739_v48, %v1725_v35 }
 0x315   : > { %v1742_v15 = vmul.f32 0.1, %v1740_v14  ;;  %v1743_v54 = vmul.f32 0.1, %v1741_v34 }
 0x317   : > { %v1744_v10 = vmax.f32 %v1740_v14, %v1742_v15  ;;  %v1745_v16 = vmax.f32 %v1741_v34, %v1743_v54 }
 0x319   : > { %1887 = vst [vmem:[%s448_s18 + $0x8] sm:$0xff] %v1745_v16  ;;  %1886 = vst [vmem:[%s448_s18] sm:$0xff] %v1744_v10  ;;  %v1761_v0 = vrot.slane %v1744_v10, %v3863_v2  ;;  %v1765_v56 = vrot.slane %v1745_v16, %v3863_v2  ;;  %v1781_v59 = vrot.slane %v1745_v16, %v3864_v46 }
 0x31a   : > { %v1777_v23 = vrot.slane %v1744_v10, %v3864_v46  ;;  %v1793_v49 = vrot.slane %v1744_v10, %v3865_v55  ;;  %v1797_v44 = vrot.slane %v1745_v16, %v3865_v55  ;;  %v1813_v27 = vrot.slane %v1745_v16, %v3866_v9 }
 0x31b   : > { %v1766_v1 = vmul.f32 %v1761_v0, %v1756_v21  ;;  %v1767_v31 = vmul.f32 %v1765_v56, %v1756_v21  ;;  %v1809_v51 = vrot.slane %v1744_v10, %v3866_v9  ;;  %v1829_v32 = vrot.slane %v1745_v16, %v2322_v26 }
 0x31c   : > { %v1798_v58 = vmul.f32 %v1793_v49, %v1788_v40  ;;  %v1799_v12 = vmul.f32 %v1797_v44, %v1788_v40  ;;  %v1825_v20 = vrot.slane %v1744_v10, %v2322_v26  ;;  %v1841_v4 = vrot.slane %v1744_v10, %v3867_v63 }
 0x31d   : > { %v1845_v37 = vrot.slane %v1745_v16, %v3867_v63  ;;  %v1861_v52 = vrot.slane %v1745_v16, %v3868_v6  ;;  %v1857_v19 = vrot.slane %v1744_v10, %v3868_v6  ;;  %v1877_v39 = vrot.slane %v1745_v16, %v3869_v13 }
 0x31e   : > { %v1751_v25 = vpop.permute.xlu1 %1750  ;;  %v1846_v57 = vmul.f32 %v1841_v4, %v1836_v17  ;;  %v1873_v22 = vrot.slane %v1744_v10, %v3869_v13 }
 0x31f   : > { %v1768_v5 = vadd.f32 %v1766_v1, %v1751_v25  ;;  %v1769_v29 = vadd.f32 %v1767_v31, %v1751_v25  ;;  %v1847_v33 = vmul.f32 %v1845_v37, %v1836_v17 }
 0x323   : > { %v1772_v41 = vpop.permute.xlu1 %1771 }
 0x324   : > { %v1782_v61 = vmul.f32 %v1777_v23, %v1772_v41  ;;  %v1783_v42 = vmul.f32 %v1781_v59, %v1772_v41 }
 0x326   : > { %v1784_v60 = vadd.f32 %v1782_v61, %v1768_v5  ;;  %v1785_v11 = vadd.f32 %v1783_v42, %v1769_v29 }
 0x328   : > { %v1804_v8 = vpop.permute.xlu1 %1803  ;;  %v1801_v47 = vadd.f32 %v1799_v12, %v1785_v11  ;;  %v1800_v45 = vadd.f32 %v1798_v58, %v1784_v60 }
 0x329   : > { %v1814_v50 = vmul.f32 %v1809_v51, %v1804_v8  ;;  %v1815_v30 = vmul.f32 %v1813_v27, %v1804_v8 }
 0x32b   : > { %v1816_v38 = vadd.f32 %v1814_v50, %v1800_v45  ;;  %v1817_v53 = vadd.f32 %v1815_v30, %v1801_v47 }
 0x32d   : > { %v1820_v43 = vpop.permute.xlu1 %1819 }
 0x32e   : > { %v1830_v24 = vmul.f32 %v1825_v20, %v1820_v43  ;;  %v1831_v28 = vmul.f32 %v1829_v32, %v1820_v43 }
 0x330   : > { %v1832_v36 = vadd.f32 %v1830_v24, %v1816_v38  ;;  %v1833_v62 = vadd.f32 %v1831_v28, %v1817_v53 }
 0x332   : > { %v1852_v7 = vpop.permute.xlu1 %1851  ;;  %v1849_v26 = vadd.f32 %v1847_v33, %v1833_v62  ;;  %v1848_v3 = vadd.f32 %v1846_v57, %v1832_v36 }
 0x333   : > { %v1862_v18 = vmul.f32 %v1857_v19, %v1852_v7  ;;  %v1863_v35 = vmul.f32 %v1861_v52, %v1852_v7 }
 0x335   : > { %v1864_v14 = vadd.f32 %v1862_v18, %v1848_v3  ;;  %v1865_v34 = vadd.f32 %v1863_v35, %v1849_v26 }
 0x337   : > { %v1868_v48 = vpop.permute.xlu1 %1867 }
 0x338   : > { %v1878_v15 = vmul.f32 %v1873_v22, %v1868_v48  ;;  %v1879_v54 = vmul.f32 %v1877_v39, %v1868_v48 }
 0x33a   : > { %v1880_v2 = vadd.f32 %v1878_v15, %v1864_v14  ;;  %v1881_v0 = vadd.f32 %v1879_v54, %v1865_v34 }
 0x33c   : > { %v1882_v56 = vmul.f32 0.1, %v1880_v2  ;;  %v1883_v25 = vmul.f32 0.1, %v1881_v0 }
 0x33e   : > { %v1884_v21 = vmax.f32 %v1880_v2, %v1882_v56  ;;  %v1885_v1 = vmax.f32 %v1881_v0, %v1883_v25 }
 0x340   : > { %1888 = vst [vmem:[%s453_s24] sm:$0xff] %v1884_v21  ;;  %1889 = vst [vmem:[%s453_s24 + $0x8] sm:$0xff] %v1885_v1 }
 0x341 PF: > { %s24_s25 = sadd.s32 1, %s2127_s25  }
 0x342   : > { %p21_p4 = scmp.ge.s32.totalorder %s24_s25, 4  }
 0x344   :  { %23 = sbr.rel (!%p21_p4) target bundleno = 1 (0x1), region = 110 }

</bundles_post_ra>
